<compile_context>
chip_gen: v6e
topology: v6e:2x2x1
jax: 0.10.0
libtpu: 0.0.40
codegen_flags: <defaults>
</compile_context>

<pallas_src>
import math
from functools import partial

import jax
import jax.numpy as jnp
from jax.experimental import pallas as pl
from jax.experimental.pallas import tpu as pltpu


# --------------------- kernel 1: QKV projection + RoPE ----------------------

def _proj_rope_kernel(x_ref, wq_ref, bq_ref, wk_ref, bk_ref, wv_ref, bv_ref,
                      cos_ref, sin_ref, q_ref, k_ref, v_ref,
                      *, num_heads, head_dim):
    hd = head_dim
    half = hd // 2
    scale = 1.0 / math.sqrt(hd)

    x = x_ref[0]                                                     # (TS, H) bf16

    # bf16 operands, f32 accumulation on the MXU; bias add in f32.
    q = jnp.dot(x, wq_ref[...], preferred_element_type=jnp.float32) + bq_ref[...]
    k = jnp.dot(x, wk_ref[...], preferred_element_type=jnp.float32) + bk_ref[...]
    v = jnp.dot(x, wv_ref[...], preferred_element_type=jnp.float32) + bv_ref[...]

    cos = cos_ref[...]                                               # (TS, hd) f32
    sin_s = sin_ref[...]                                             # sign-folded sin

    # rotate_half(t) == roll(t, hd//2, axis=-1) * [-1,...,-1,+1,...,+1]; the sign
    # is pre-folded into sin_s, so t*cos + roll(t)*sin_s == t*cos + rotate_half(t)*sin.
    for h in range(num_heads):                   # static per-head lane slices
        sl = slice(h * hd, (h + 1) * hd)
        q_h = q[:, sl]
        k_h = k[:, sl]
        q_h = q_h * cos + pltpu.roll(q_h, half, axis=1) * sin_s
        k_h = k_h * cos + pltpu.roll(k_h, half, axis=1) * sin_s
        q_ref[0, :, sl] = (q_h * scale).astype(q_ref.dtype)          # fold 1/sqrt(hd)
        k_ref[0, :, sl] = k_h.astype(k_ref.dtype)

    v_ref[0] = v.astype(v_ref.dtype)


# --------------- kernel 2: flash attention + output projection ---------------

def _flash_attn_kernel(q_ref, k_ref, v_ref, wo_ref, o_ref,
                       m_sc, l_sc, acc_sc, out_sc):
    h = pl.program_id(2)
    kv = pl.program_id(3)
    last_h = pl.num_programs(2) - 1
    last_kv = pl.num_programs(3) - 1

    @pl.when(kv == 0)
    def _():
        m_sc[...] = jnp.full(m_sc.shape, -jnp.inf, jnp.float32)
        l_sc[...] = jnp.zeros(l_sc.shape, jnp.float32)
        acc_sc[...] = jnp.zeros(acc_sc.shape, jnp.float32)

    @pl.when(jnp.logical_and(kv == 0, h == 0))
    def _():
        out_sc[...] = jnp.zeros(out_sc.shape, jnp.float32)

    q = q_ref[0]                        # (TQ, hd) bf16, already scaled by 1/sqrt(hd)
    k = k_ref[0]                        # (TK, hd) bf16
    v = v_ref[0]                        # (TK, hd) bf16

    # QK^T on the MXU (bf16 in, f32 out), online softmax in f32.
    s = jnp.einsum('qd,kd->qk', q, k, preferred_element_type=jnp.float32)
    m_prev = m_sc[...]
    m_new = jnp.maximum(m_prev, jnp.max(s, axis=-1, keepdims=True))
    alpha = jnp.exp(m_prev - m_new)
    p = jnp.exp(s - m_new)
    l_sc[...] = alpha * l_sc[...] + jnp.sum(p, axis=-1, keepdims=True)
    acc_sc[...] = alpha * acc_sc[...] + jnp.dot(
        p.astype(v.dtype), v, preferred_element_type=jnp.float32)
    m_sc[...] = m_new

    @pl.when(kv == last_kv)
    def _():
        # finalize this head's block and accumulate its output-projection slice
        attn = acc_sc[...] * pl.reciprocal(l_sc[...], approx=True)   # (TQ, hd) f32
        out_sc[...] += jnp.dot(attn.astype(wo_ref.dtype), wo_ref[...],
                               preferred_element_type=jnp.float32)

    @pl.when(jnp.logical_and(kv == last_kv, h == last_h))
    def _():
        o_ref[0] = out_sc[...].astype(o_ref.dtype)


# ------------------------------ JAX wrapper ---------------------------------

def sundial_attention(hidden_states, params, cos, sin, *, num_heads,
                      seq_block=128, q_block=128, kv_block=128):
    """hidden_states: (bsz, S, H); params: pre-transposed (in, out) weights."""
    bsz, S, H = hidden_states.shape
    hd = H // num_heads
    assert H == num_heads * hd

    TS = min(seq_block, S)
    TQ = min(q_block, S)
    TK = min(kv_block, S)
    assert S % TS == 0 and S % TQ == 0 and S % TK == 0, "seq_len must divide tiles"

    bf16 = jnp.bfloat16
    x = hidden_states.astype(bf16)
    wq = params["wq"].astype(bf16)
    wk = params["wk"].astype(bf16)
    wv = params["wv"].astype(bf16)
    wo = params["wo"].astype(bf16)
    bq = params["bq"].astype(jnp.float32)
    bk = params["bk"].astype(jnp.float32)
    bv = params["bv"].astype(jnp.float32)

    # Pre-fold the rotate_half sign into the sin table.
    half = hd // 2
    sign = jnp.concatenate([-jnp.ones((half,), jnp.float32),
                            jnp.ones((half,), jnp.float32)])
    cos_f = cos.astype(jnp.float32)
    sin_s = sin.astype(jnp.float32) * sign[None, :]

    const = dict(pipeline_mode=pl.Buffered(buffer_count=1))   # grid-invariant blocks

    # ---- kernel 1: projections + rotary ----
    proj_cost = pl.CostEstimate(
        flops=2 * 3 * bsz * S * H * H,
        transcendentals=0,
        bytes_accessed=4 * bsz * S * H * 2 + 3 * H * H * 2 + 3 * H * 4 + 2 * S * hd * 4,
    )
    q, k, v = pl.pallas_call(
        partial(_proj_rope_kernel, num_heads=num_heads, head_dim=hd),
        out_shape=(jax.ShapeDtypeStruct((bsz, S, H), bf16),) * 3,
        grid_spec=pltpu.PrefetchScalarGridSpec(
            num_scalar_prefetch=0,
            grid=(bsz, S // TS),
            in_specs=[
                pl.BlockSpec((1, TS, H), lambda b, s: (b, s, 0)),      # x
                pl.BlockSpec((H, H), lambda b, s: (0, 0), **const),    # Wq
                pl.BlockSpec((1, H), lambda b, s: (0, 0), **const),    # bq
                pl.BlockSpec((H, H), lambda b, s: (0, 0), **const),    # Wk
                pl.BlockSpec((1, H), lambda b, s: (0, 0), **const),    # bk
                pl.BlockSpec((H, H), lambda b, s: (0, 0), **const),    # Wv
                pl.BlockSpec((1, H), lambda b, s: (0, 0), **const),    # bv
                pl.BlockSpec((TS, hd), lambda b, s: (s, 0)),           # cos
                pl.BlockSpec((TS, hd), lambda b, s: (s, 0)),           # sin * sign
            ],
            out_specs=(pl.BlockSpec((1, TS, H), lambda b, s: (b, s, 0)),) * 3,
        ),
        compiler_params=pltpu.CompilerParams(
            dimension_semantics=("parallel", "parallel")),
        cost_estimate=proj_cost,
    )(x, wq, bq, wk, bk, wv, bv, cos_f, sin_s)

    # ---- kernel 2: flash attention + output projection ----
    attn_cost = pl.CostEstimate(
        flops=4 * bsz * num_heads * S * S * hd + 2 * bsz * S * H * H,
        transcendentals=bsz * num_heads * S * S,
        bytes_accessed=3 * bsz * S * H * 2 + H * H * 2 + bsz * S * H * 4,
    )
    out = pl.pallas_call(
        _flash_attn_kernel,
        out_shape=jax.ShapeDtypeStruct((bsz, S, H), hidden_states.dtype),
        grid_spec=pltpu.PrefetchScalarGridSpec(
            num_scalar_prefetch=0,
            grid=(bsz, S // TQ, num_heads, S // TK),
            in_specs=[
                pl.BlockSpec((1, TQ, hd), lambda b, qi, h, ki: (b, qi, h)),  # q
                pl.BlockSpec((1, TK, hd), lambda b, qi, h, ki: (b, ki, h)),  # k
                pl.BlockSpec((1, TK, hd), lambda b, qi, h, ki: (b, ki, h)),  # v
                pl.BlockSpec((hd, H), lambda b, qi, h, ki: (h, 0)),          # Wo rows
            ],
            out_specs=pl.BlockSpec((1, TQ, H), lambda b, qi, h, ki: (b, qi, 0)),
            scratch_shapes=[
                pltpu.VMEM((TQ, 1), jnp.float32),    # running max
                pltpu.VMEM((TQ, 1), jnp.float32),    # running denominator
                pltpu.VMEM((TQ, hd), jnp.float32),   # per-head numerator
                pltpu.VMEM((TQ, H), jnp.float32),    # output accumulator
            ],
        ),
        compiler_params=pltpu.CompilerParams(
            dimension_semantics=("parallel", "parallel", "arbitrary", "arbitrary")),
        cost_estimate=attn_cost,
    )(q, k, v, wo)
    return out


def make_rotary_tables(seq_len, head_dim, base=10000.0, dtype=jnp.float32):
    inv_freq = 1.0 / (base ** (jnp.arange(0, head_dim, 2, dtype=jnp.float32) / head_dim))
    t = jnp.arange(seq_len, dtype=jnp.float32)
    freqs = jnp.outer(t, inv_freq)                       # (seq, head_dim/2)
    emb = jnp.concatenate([freqs, freqs], axis=-1)       # (seq, head_dim)
    return jnp.cos(emb).astype(dtype), jnp.sin(emb).astype(dtype)


# ------------------------- pure-JAX reference (check) ------------------------

def reference_attention(x, params, cos, sin, *, num_heads):
    bsz, S, H = x.shape
    hd = H // num_heads
    q = x @ params["wq"] + params["bq"][0]
    k = x @ params["wk"] + params["bk"][0]
    v = x @ params["wv"] + params["bv"][0]

    def split(t):
        return t.reshape(bsz, S, num_heads, hd).transpose(0, 2, 1, 3)

    q, k, v = split(q), split(k), split(v)
    c = cos[None, None]
    s = sin[None, None]
    rot = lambda t: jnp.concatenate([-t[..., hd // 2:], t[..., :hd // 2]], axis=-1)
    q = q * c + rot(q) * s
    k = k * c + rot(k) * s
    scores = jnp.einsum('bhqd,bhkd->bhqk', q, k) / math.sqrt(hd)
    p = jax.nn.softmax(scores, axis=-1)
    attn = jnp.einsum('bhqk,bhkd->bhqd', p, v)
    attn = attn.transpose(0, 2, 1, 3).reshape(bsz, S, H)
    return attn @ params["wo"]


# ---------------------------------- main -------------------------------------

if __name__ == "__main__":
    # hidden=256, heads=2 -> head_dim=128 (lane-/MXU-aligned), seq=256, batch=2:
    # exercises 2 seq blocks, 2 q blocks, 2 kv blocks and 2 heads per element.
    bsz, seq_len, hidden, num_heads = 2, 256, 256, 2
    head_dim = hidden // num_heads

    key = jax.random.PRNGKey(0)
    keys = jax.random.split(key, 8)
    scale = 0.05

    # Linear weights are stored pre-transposed: (in_features, out_features),
    # so y = x @ W + b matches PyTorch's nn.Linear (y = x @ W_pt.T + b).
    params = {
        "wq": scale * jax.random.normal(keys[0], (hidden, hidden), jnp.float32),
        "bq": scale * jax.random.normal(keys[1], (1, hidden), jnp.float32),
        "wk": scale * jax.random.normal(keys[2], (hidden, hidden), jnp.float32),
        "bk": scale * jax.random.normal(keys[3], (1, hidden), jnp.float32),
        "wv": scale * jax.random.normal(keys[4], (hidden, hidden), jnp.float32),
        "bv": scale * jax.random.normal(keys[5], (1, hidden), jnp.float32),
        "wo": scale * jax.random.normal(keys[6], (hidden, hidden), jnp.float32),
    }
    hidden_states = jax.random.normal(keys[7], (bsz, seq_len, hidden), jnp.float32)

    # position_ids = arange(seq_len) for every batch element -> cos/sin tables
    # are already per-position (glue for cos[position_ids]).
    cos, sin = make_rotary_tables(seq_len, head_dim)

    out = sundial_attention(hidden_states, params, cos, sin, num_heads=num_heads)
    out = jax.block_until_ready(out)

    # Reference in f32 on the same bf16-rounded operands the kernel consumes
    # (kernel keeps f32 accumulation / softmax stats, so only cast noise remains).
    rnd = lambda a: a.astype(jnp.bfloat16).astype(jnp.float32)
    params_r = {n: (rnd(w) if n.startswith("w") else w) for n, w in params.items()}
    ref = reference_attention(rnd(hidden_states), params_r, cos, sin,
                              num_heads=num_heads)

    assert out.shape == (bsz, seq_len, hidden)
    err = float(jnp.max(jnp.abs(out - ref)))
    assert jnp.allclose(out, ref, atol=3e-2, rtol=3e-2), f"mismatch, max abs err {err}"

    # TODO(synk): attention_mask / causal masking, attention dropout (training)
    # and past_key_value cache update/return are not modeled; this matches
    # inference with attention_mask=None.
    print("KERNEL_OK")
</pallas_src>

<mosaic_0001>
module attributes {stable_mosaic.version = 11 : i64} {
  func.func @_proj_rope_kernel(%arg0: i32, %arg1: i32, %arg2: memref<1x128x256xbf16, #tpu.memory_space<vmem>>, %arg3: memref<256x256xbf16, #tpu.memory_space<vmem>>, %arg4: memref<1x256xf32, #tpu.memory_space<vmem>>, %arg5: memref<256x256xbf16, #tpu.memory_space<vmem>>, %arg6: memref<1x256xf32, #tpu.memory_space<vmem>>, %arg7: memref<256x256xbf16, #tpu.memory_space<vmem>>, %arg8: memref<1x256xf32, #tpu.memory_space<vmem>>, %arg9: memref<128x128xf32, #tpu.memory_space<vmem>>, %arg10: memref<128x128xf32, #tpu.memory_space<vmem>>, %arg11: memref<1x128x256xbf16, #tpu.memory_space<vmem>>, %arg12: memref<1x128x256xbf16, #tpu.memory_space<vmem>>, %arg13: memref<1x128x256xbf16, #tpu.memory_space<vmem>>) attributes {dimension_semantics = [#tpu.dimension_semantics<parallel>, #tpu.dimension_semantics<parallel>], iteration_bounds = array<i64: 2, 2>, scalar_prefetch = 0 : i64, scratch_operands = 0 : i64, tpu.core_type = #tpu.core_type<tc>, window_params = [{transform_indices = @transform_0, window_bounds = array<i64: 1, 128, 256>}, {pipeline_mode = #tpu.pipeline_mode<synchronous>, transform_indices = @transform_1, window_bounds = array<i64: 256, 256>}, {pipeline_mode = #tpu.pipeline_mode<synchronous>, transform_indices = @transform_2, window_bounds = array<i64: 1, 256>}, {pipeline_mode = #tpu.pipeline_mode<synchronous>, transform_indices = @transform_3, window_bounds = array<i64: 256, 256>}, {pipeline_mode = #tpu.pipeline_mode<synchronous>, transform_indices = @transform_4, window_bounds = array<i64: 1, 256>}, {pipeline_mode = #tpu.pipeline_mode<synchronous>, transform_indices = @transform_5, window_bounds = array<i64: 256, 256>}, {pipeline_mode = #tpu.pipeline_mode<synchronous>, transform_indices = @transform_6, window_bounds = array<i64: 1, 256>}, {transform_indices = @transform_7, window_bounds = array<i64: 128, 128>}, {transform_indices = @transform_8, window_bounds = array<i64: 128, 128>}, {transform_indices = @transform_9, window_bounds = array<i64: 1, 128, 256>}, {transform_indices = @transform_10, window_bounds = array<i64: 1, 128, 256>}, {transform_indices = @transform_11, window_bounds = array<i64: 1, 128, 256>}]} {
    %c0 = arith.constant 0 : index
    %c0_0 = arith.constant 0 : index
    %c0_1 = arith.constant 0 : index
    %0 = vector.load %arg2[%c0, %c0_0, %c0_1] : memref<1x128x256xbf16, #tpu.memory_space<vmem>>, vector<1x128x256xbf16>
    %1 = vector.shape_cast %0 : vector<1x128x256xbf16> to vector<128x256xbf16>
    %c0_2 = arith.constant 0 : index
    %c0_3 = arith.constant 0 : index
    %2 = vector.load %arg3[%c0_2, %c0_3] : memref<256x256xbf16, #tpu.memory_space<vmem>>, vector<256x256xbf16>
    %cst = arith.constant dense<0.000000e+00> : vector<128x256xf32>
    %3 = tpu.matmul %1, %2, %cst {dimension_numbers = #tpu.dot_dimension_numbers<[1], [0], [0], [1], [0, 0, 1, 1], [], []>} : vector<128x256xbf16>, vector<256x256xbf16>, vector<128x256xf32> -> vector<128x256xf32>
    %c0_4 = arith.constant 0 : index
    %c0_5 = arith.constant 0 : index
    %4 = vector.load %arg4[%c0_4, %c0_5] : memref<1x256xf32, #tpu.memory_space<vmem>>, vector<1x256xf32>
    %5 = vector.broadcast %4 : vector<1x256xf32> to vector<128x256xf32>
    %6 = arith.addf %3, %5 : vector<128x256xf32>
    %c0_6 = arith.constant 0 : index
    %c0_7 = arith.constant 0 : index
    %7 = vector.load %arg5[%c0_6, %c0_7] : memref<256x256xbf16, #tpu.memory_space<vmem>>, vector<256x256xbf16>
    %cst_8 = arith.constant dense<0.000000e+00> : vector<128x256xf32>
    %8 = tpu.matmul %1, %7, %cst_8 {dimension_numbers = #tpu.dot_dimension_numbers<[1], [0], [0], [1], [0, 0, 1, 1], [], []>} : vector<128x256xbf16>, vector<256x256xbf16>, vector<128x256xf32> -> vector<128x256xf32>
    %c0_9 = arith.constant 0 : index
    %c0_10 = arith.constant 0 : index
    %9 = vector.load %arg6[%c0_9, %c0_10] : memref<1x256xf32, #tpu.memory_space<vmem>>, vector<1x256xf32>
    %10 = vector.broadcast %9 : vector<1x256xf32> to vector<128x256xf32>
    %11 = arith.addf %8, %10 : vector<128x256xf32>
    %c0_11 = arith.constant 0 : index
    %c0_12 = arith.constant 0 : index
    %12 = vector.load %arg7[%c0_11, %c0_12] : memref<256x256xbf16, #tpu.memory_space<vmem>>, vector<256x256xbf16>
    %cst_13 = arith.constant dense<0.000000e+00> : vector<128x256xf32>
    %13 = tpu.matmul %1, %12, %cst_13 {dimension_numbers = #tpu.dot_dimension_numbers<[1], [0], [0], [1], [0, 0, 1, 1], [], []>} : vector<128x256xbf16>, vector<256x256xbf16>, vector<128x256xf32> -> vector<128x256xf32>
    %c0_14 = arith.constant 0 : index
    %c0_15 = arith.constant 0 : index
    %14 = vector.load %arg8[%c0_14, %c0_15] : memref<1x256xf32, #tpu.memory_space<vmem>>, vector<1x256xf32>
    %15 = vector.broadcast %14 : vector<1x256xf32> to vector<128x256xf32>
    %16 = arith.addf %13, %15 : vector<128x256xf32>
    %c0_16 = arith.constant 0 : index
    %c0_17 = arith.constant 0 : index
    %17 = vector.load %arg9[%c0_16, %c0_17] : memref<128x128xf32, #tpu.memory_space<vmem>>, vector<128x128xf32>
    %c0_18 = arith.constant 0 : index
    %c0_19 = arith.constant 0 : index
    %18 = vector.load %arg10[%c0_18, %c0_19] : memref<128x128xf32, #tpu.memory_space<vmem>>, vector<128x128xf32>
    %19 = vector.extract_strided_slice %6 {offsets = [0, 0], sizes = [128, 128], strides = [1, 1]} : vector<128x256xf32> to vector<128x128xf32>
    %20 = vector.extract_strided_slice %11 {offsets = [0, 0], sizes = [128, 128], strides = [1, 1]} : vector<128x256xf32> to vector<128x128xf32>
    %21 = arith.mulf %19, %17 : vector<128x128xf32>
    %c64_i32 = arith.constant 64 : i32
    %22 = tpu.dynamic_rotate %19 by %c64_i32 dim 1 : vector<128x128xf32>, i32 -> vector<128x128xf32>
    %23 = arith.mulf %22, %18 : vector<128x128xf32>
    %24 = arith.addf %21, %23 : vector<128x128xf32>
    %25 = arith.mulf %20, %17 : vector<128x128xf32>
    %c64_i32_20 = arith.constant 64 : i32
    %26 = tpu.dynamic_rotate %20 by %c64_i32_20 dim 1 : vector<128x128xf32>, i32 -> vector<128x128xf32>
    %27 = arith.mulf %26, %18 : vector<128x128xf32>
    %28 = arith.addf %25, %27 : vector<128x128xf32>
    %cst_21 = arith.constant 0.0883883461 : f32
    %29 = vector.broadcast %cst_21 : f32 to vector<128x128xf32>
    %30 = arith.mulf %24, %29 : vector<128x128xf32>
    %31 = arith.truncf %30 : vector<128x128xf32> to vector<128x128xbf16>
    %c0_22 = arith.constant 0 : index
    %c0_23 = arith.constant 0 : index
    %c0_24 = arith.constant 0 : index
    %32 = vector.load %arg11[%c0_22, %c0_23, %c0_24] : memref<1x128x256xbf16, #tpu.memory_space<vmem>>, vector<1x128x128xbf16>
    %33 = vector.shape_cast %32 : vector<1x128x128xbf16> to vector<128x128xbf16>
    %34 = vector.shape_cast %31 : vector<128x128xbf16> to vector<1x128x128xbf16>
    tpu.vector_store %arg11[%c0_22, %c0_23, %c0_24], %34 {strides = array<i32>} : memref<1x128x256xbf16, #tpu.memory_space<vmem>>, vector<1x128x128xbf16>,
    %35 = arith.truncf %28 : vector<128x128xf32> to vector<128x128xbf16>
    %c0_25 = arith.constant 0 : index
    %c0_26 = arith.constant 0 : index
    %c0_27 = arith.constant 0 : index
    %36 = vector.load %arg12[%c0_25, %c0_26, %c0_27] : memref<1x128x256xbf16, #tpu.memory_space<vmem>>, vector<1x128x128xbf16>
    %37 = vector.shape_cast %36 : vector<1x128x128xbf16> to vector<128x128xbf16>
    %38 = vector.shape_cast %35 : vector<128x128xbf16> to vector<1x128x128xbf16>
    tpu.vector_store %arg12[%c0_25, %c0_26, %c0_27], %38 {strides = array<i32>} : memref<1x128x256xbf16, #tpu.memory_space<vmem>>, vector<1x128x128xbf16>,
    %39 = vector.extract_strided_slice %6 {offsets = [0, 128], sizes = [128, 128], strides = [1, 1]} : vector<128x256xf32> to vector<128x128xf32>
    %40 = vector.extract_strided_slice %11 {offsets = [0, 128], sizes = [128, 128], strides = [1, 1]} : vector<128x256xf32> to vector<128x128xf32>
    %41 = arith.mulf %39, %17 : vector<128x128xf32>
    %c64_i32_28 = arith.constant 64 : i32
    %42 = tpu.dynamic_rotate %39 by %c64_i32_28 dim 1 : vector<128x128xf32>, i32 -> vector<128x128xf32>
    %43 = arith.mulf %42, %18 : vector<128x128xf32>
    %44 = arith.addf %41, %43 : vector<128x128xf32>
    %45 = arith.mulf %40, %17 : vector<128x128xf32>
    %c64_i32_29 = arith.constant 64 : i32
    %46 = tpu.dynamic_rotate %40 by %c64_i32_29 dim 1 : vector<128x128xf32>, i32 -> vector<128x128xf32>
    %47 = arith.mulf %46, %18 : vector<128x128xf32>
    %48 = arith.addf %45, %47 : vector<128x128xf32>
    %cst_30 = arith.constant 0.0883883461 : f32
    %49 = vector.broadcast %cst_30 : f32 to vector<128x128xf32>
    %50 = arith.mulf %44, %49 : vector<128x128xf32>
    %51 = arith.truncf %50 : vector<128x128xf32> to vector<128x128xbf16>
    %c0_31 = arith.constant 0 : index
    %c0_32 = arith.constant 0 : index
    %c128 = arith.constant 128 : index
    %52 = vector.load %arg11[%c0_31, %c0_32, %c128] : memref<1x128x256xbf16, #tpu.memory_space<vmem>>, vector<1x128x128xbf16>
    %53 = vector.shape_cast %52 : vector<1x128x128xbf16> to vector<128x128xbf16>
    %54 = vector.shape_cast %51 : vector<128x128xbf16> to vector<1x128x128xbf16>
    tpu.vector_store %arg11[%c0_31, %c0_32, %c128], %54 {strides = array<i32>} : memref<1x128x256xbf16, #tpu.memory_space<vmem>>, vector<1x128x128xbf16>,
    %55 = arith.truncf %48 : vector<128x128xf32> to vector<128x128xbf16>
    %c0_33 = arith.constant 0 : index
    %c0_34 = arith.constant 0 : index
    %c128_35 = arith.constant 128 : index
    %56 = vector.load %arg12[%c0_33, %c0_34, %c128_35] : memref<1x128x256xbf16, #tpu.memory_space<vmem>>, vector<1x128x128xbf16>
    %57 = vector.shape_cast %56 : vector<1x128x128xbf16> to vector<128x128xbf16>
    %58 = vector.shape_cast %55 : vector<128x128xbf16> to vector<1x128x128xbf16>
    tpu.vector_store %arg12[%c0_33, %c0_34, %c128_35], %58 {strides = array<i32>} : memref<1x128x256xbf16, #tpu.memory_space<vmem>>, vector<1x128x128xbf16>,
    %59 = arith.truncf %16 : vector<128x256xf32> to vector<128x256xbf16>
    %c0_36 = arith.constant 0 : index
    %c0_37 = arith.constant 0 : index
    %c0_38 = arith.constant 0 : index
    %60 = vector.load %arg13[%c0_36, %c0_37, %c0_38] : memref<1x128x256xbf16, #tpu.memory_space<vmem>>, vector<1x128x256xbf16>
    %61 = vector.shape_cast %60 : vector<1x128x256xbf16> to vector<128x256xbf16>
    %62 = vector.shape_cast %59 : vector<128x256xbf16> to vector<1x128x256xbf16>
    tpu.vector_store %arg13[%c0_36, %c0_37, %c0_38], %62 {strides = array<i32>} : memref<1x128x256xbf16, #tpu.memory_space<vmem>>, vector<1x128x256xbf16>,
    return
  }
  func.func @transform_0(%arg0: i32, %arg1: i32) -> (i32, i32, i32) {
    %c0_i32 = arith.constant 0 : i32
    %c0_i32_0 = arith.constant 0 : i32
    return %arg0, %arg1, %c0_i32 : i32, i32, i32
  }
  func.func @transform_1(%arg0: i32, %arg1: i32) -> (i32, i32) {
    %c0_i32 = arith.constant 0 : i32
    %c0_i32_0 = arith.constant 0 : i32
    %c0_i32_1 = arith.constant 0 : i32
    return %c0_i32, %c0_i32_0 : i32, i32
  }
  func.func @transform_2(%arg0: i32, %arg1: i32) -> (i32, i32) {
    %c0_i32 = arith.constant 0 : i32
    %c0_i32_0 = arith.constant 0 : i32
    %c0_i32_1 = arith.constant 0 : i32
    return %c0_i32, %c0_i32_0 : i32, i32
  }
  func.func @transform_3(%arg0: i32, %arg1: i32) -> (i32, i32) {
    %c0_i32 = arith.constant 0 : i32
    %c0_i32_0 = arith.constant 0 : i32
    %c0_i32_1 = arith.constant 0 : i32
    return %c0_i32, %c0_i32_0 : i32, i32
  }
  func.func @transform_4(%arg0: i32, %arg1: i32) -> (i32, i32) {
    %c0_i32 = arith.constant 0 : i32
    %c0_i32_0 = arith.constant 0 : i32
    %c0_i32_1 = arith.constant 0 : i32
    return %c0_i32, %c0_i32_0 : i32, i32
  }
  func.func @transform_5(%arg0: i32, %arg1: i32) -> (i32, i32) {
    %c0_i32 = arith.constant 0 : i32
    %c0_i32_0 = arith.constant 0 : i32
    %c0_i32_1 = arith.constant 0 : i32
    return %c0_i32, %c0_i32_0 : i32, i32
  }
  func.func @transform_6(%arg0: i32, %arg1: i32) -> (i32, i32) {
    %c0_i32 = arith.constant 0 : i32
    %c0_i32_0 = arith.constant 0 : i32
    %c0_i32_1 = arith.constant 0 : i32
    return %c0_i32, %c0_i32_0 : i32, i32
  }
  func.func @transform_7(%arg0: i32, %arg1: i32) -> (i32, i32) {
    %c0_i32 = arith.constant 0 : i32
    %c0_i32_0 = arith.constant 0 : i32
    return %arg1, %c0_i32 : i32, i32
  }
  func.func @transform_8(%arg0: i32, %arg1: i32) -> (i32, i32) {
    %c0_i32 = arith.constant 0 : i32
    %c0_i32_0 = arith.constant 0 : i32
    return %arg1, %c0_i32 : i32, i32
  }
  func.func @transform_9(%arg0: i32, %arg1: i32) -> (i32, i32, i32) {
    %c0_i32 = arith.constant 0 : i32
    %c0_i32_0 = arith.constant 0 : i32
    return %arg0, %arg1, %c0_i32 : i32, i32, i32
  }
  func.func @transform_10(%arg0: i32, %arg1: i32) -> (i32, i32, i32) {
    %c0_i32 = arith.constant 0 : i32
    %c0_i32_0 = arith.constant 0 : i32
    return %arg0, %arg1, %c0_i32 : i32, i32, i32
  }
  func.func @transform_11(%arg0: i32, %arg1: i32) -> (i32, i32, i32) {
    %c0_i32 = arith.constant 0 : i32
    %c0_i32_0 = arith.constant 0 : i32
    return %arg0, %arg1, %c0_i32 : i32, i32, i32
  }
}

</mosaic_0001>

<bundles_post_ra>
// kernel: tpu_custom_call.1
= control target key start
LH: loop header
LB: loop body
LE: loop exit
PB: predicated region body
PF: predicated region fallthrough
CT: control target
= control target key end

     0   :  { %s4991_s0 = inlined_call_operand.hbm [shape: bf16[2,256,256], index: 0, kind: input, shape index: {}]   ;;  %s4992_s1 = inlined_call_operand.hbm [shape: bf16[256,256], index: 1, kind: input, shape index: {}]   ;;  %s4993_s2 = inlined_call_operand.vmem [shape: f32[1,256], index: 2, kind: input, shape index: {}]   ;;  %s4994_s3 = inlined_call_operand.hbm [shape: bf16[256,256], index: 3, kind: input, shape index: {}]   ;;  %s4995_s4 = inlined_call_operand.vmem [shape: f32[1,256], index: 4, kind: input, shape index: {}]   ;;  %s4996_s5 = inlined_call_operand.hbm [shape: bf16[256,256], index: 5, kind: input, shape index: {}]   ;;  %s4997_s6 = inlined_call_operand.vmem [shape: f32[1,256], index: 6, kind: input, shape index: {}]   ;;  %s4998_s7 = inlined_call_operand.hbm [shape: f32[256,128], index: 7, kind: input, shape index: {}]   ;;  %s4999_s8 = inlined_call_operand.hbm [shape: f32[256,128], index: 8, kind: input, shape index: {}]   ;;  %s5000_s9 = inlined_call_operand.hbm [shape: bf16[2,256,256], index: 9, kind: output, shape index: {0}]   ;;  %s5001_s10 = inlined_call_operand.hbm [shape: bf16[2,256,256], index: 10, kind: output, shape index: {1}]   ;;  %s5002_s11 = inlined_call_operand.hbm [shape: bf16[2,256,256], index: 11, kind: output, shape index: {2}]  }
   0x1   :  { %5044 = sst [smem:[#allocation55_spill]] %s4991_s0 }
   0x2   :  { %5045 = sst [smem:[#allocation56_spill]] %s4992_s1 }
   0x3   :  { %5046 = sst [smem:[#allocation57_spill]] %s4993_s2 }
   0x4   :  { %5047 = sst [smem:[#allocation58_spill]] %s4994_s3 }
   0x5   :  { %5048 = sst [smem:[#allocation59_spill]] %s4995_s4 }
   0x6   :  { %5049 = sst [smem:[#allocation60_spill]] %s4996_s5 }
   0x7   :  { %5050 = sst [smem:[#allocation61_spill]] %s4997_s6 }
   0x8   :  { %5051 = sst [smem:[#allocation62_spill]] %s4998_s7 }
   0x9   :  { %5052 = sst [smem:[#allocation63_spill]] %s4999_s8 }
   0xa   :  { %5053 = sst [smem:[#allocation64_spill]] %s5000_s9 }
   0xb   :  { %5054 = sst [smem:[#allocation65_spill]] %s5001_s10 }
   0xc   :  { %5055 = sst [smem:[#allocation66_spill]] %s5002_s11 }
   0xd   :  { %17 = vsyncpa [#allocation3], 0 }
   0xe   :  { %19 = vsyncpa [#allocation3 + $0x1], 0 }
   0xf   :  { %20 = vsyncpa [#allocation6], 0 }
  0x10   :  { %21 = vsyncpa [#allocation9], 0 }
  0x11   :  { %22 = vsyncpa [#allocation4], 0 }
  0x12   :  { %24 = vsyncpa [#allocation4 + $0x1], 0 }
  0x13   :  { %25 = vsyncpa [#allocation14], 0 }
  0x14   :  { %27 = vsyncpa [#allocation14 + $0x1], 0  ;;  %s3831_s17 = smov 0   ;;  %s3833_s18 = smov 0  }
  0x15   :  { %s3835_s19 = smov 0   ;;  %s3837_s20 = smov 0  }
  0x16   :  { %s3839_s21 = smov 0   ;;  %s3841_s22 = smov 0  }
  0x17   :  { %s3843_s23 = smov 0   ;;  %s3845_s24 = smov 0  }
  0x18   :  { %s3847_s25 = smov 0   ;;  %s3849_s26 = smov 0  }
  0x19   :  { %s3851_s27 = smov 0  }
  0x1a LB: > { %5056 = sst [smem:[#allocation22_spill]] %s3735_s22  ;;  %s42_s28 = sadd.s32 1, %s3747_s25  ;;  %s3755_s27 = sphi %s3851_s27, %s33_s27   ;;  %s3751_s26 = sphi %s3849_s26, %s5155_s26   ;;  %s3747_s25 = sphi %s3847_s25, %s5162_s25   ;;  %s3743_s24 = sphi %s3845_s24, %s5153_s24   ;;  %s3739_s23 = sphi %s3843_s23, %s5161_s23   ;;  %s3735_s22 = sphi %s3841_s22, %s5152_s22   ;;  %s3731_s21 = sphi %s3839_s21, %s5160_s21   ;;  %s3727_s20 = sphi %s3837_s20, %s5159_s20   ;;  %s3723_s19 = sphi %s3835_s19, %s5158_s19   ;;  %s3719_s18 = sphi %s3833_s18, %s5157_s18   ;;  %s3715_s17 = sphi %s3831_s17, %s5156_s17  }
  0x1b   : > { %5057 = sst [smem:[#allocation23_spill]] %s3739_s23  ;;  %s45_s29 = sadd.s32 1, %s3751_s26 }
  0x1c   : > { %5058 = sst [smem:[#allocation24_spill]] %s3743_s24  ;;  %p43_p0 = scmp.ge.s32.totalorder %s42_s28, 2 }
  0x1d   : > { %5059 = sst [smem:[#allocation25_spill]] %s3751_s26  ;;  %s54_s30 = sadd.s32 1, %s3735_s22 }
  0x1e   : > { %p61_p1 = scmp.ne.s32.totalorder %s3735_s22, %s3731_s21  ;;  %p5008_p2 = scmp.eq.s32.totalorder %s3755_s27, 0 }
  0x1f   : > { %s5164_s28 = smov (%p43_p0, %s42_s28), 0  ;;  %s5166_s29 = smov (!%p43_p0, %s45_s29), %s3751_s26 }
  0x20   : > { %5060 = sst [smem:[#allocation26_spill]] %s5164_s28  ;;  %s3897_s12 = ssub.s32 %s3747_s25, %s5164_s28 }
  0x21   : > { %p3904_p3 = por %p5008_p2, %p61_p1  ;;  %p47_p4 = scmp.ge.s32.totalorder %s5166_s29, 2 }
  0x22   : > { %p204_p5 = scmp.eq.s32.totalorder %s3897_s12, 0  ;;  %p5007_p6 = scmp.lt.s32.totalorder %s3755_s27, 4 }
  0x23   : > { %s5168_s29 = smov (%p47_p4, %s5166_s29), 0  ;;  %s401_s15 = sand.u32 1, %s3755_s27  }
  0x24   : > { %5062 = sst [smem:[#allocation27_spill]] %s5168_s29  ;;  %s49_s14 = ssub.s32 %s3751_s26, %s5168_s29 }
  0x25   : > { %s51_s16 = sor.u32 %s3897_s12, %s49_s14  ;;  %s403_s28 = sand.u32 1, %s3735_s22  }
  0x26   : > { %p52_p7 = scmp.eq.s32.totalorder %s51_s16, 0  ;;  %s2731_s11 = sshll.u32 %s403_s28, 7 }
  0x27   : > { %s2961_s10 = sshll.u32 %s3747_s25, 5  ;;  %s2734_s24 = sshll.u32 %s3751_s26, 6 }
  0x28   : > { %s3919_s9 = scalar_select %p52_p7, %s3735_s22, %s54_s30  }
  0x29   : > { %s412_s23 = sadd.s32 %s2961_s10, %s2734_s24  ;;  %s405_s6 = scalar_lea.vmem [#allocation2], %s2731_s11 }
  0x2a   : > { %5063 = sst [smem:[#allocation28_spill]] %s3919_s9  ;;  %s415_s4 = sshll.u32 %s405_s6, 4  ;;  %s416_s4 = int_to_ptr.vmem [resolvable:$true] %s415_s4 }
  0x2b   : > { %s2735_s2 = sshll.u32 %s412_s23, 6  ;;  %s5064_s0 = sld [smem:[#allocation55_spill]] }
  0x2c   : > { %p3929_p8 = pnand %p5007_p6, %p3904_p3  ;;  %s3933_s28 = scalar_lea.sflag [#allocation3], %s401_s15 }
  0x2d   : > { %s3418_s10 = scalar_lea.vmem %s416_s4, 2048  ;;  %s3757_s6 = smov [#allocation2]  }
  0x2e   : > { %p3407_p9 = pneg %p3929_p8  ;;  %p3419_p10 = scmp.ne.s32.totalorder %s416_s4, %s3418_s10 }
  0x2f   : > { %s3423_s11 = sshll.u32 %s3757_s6, 4  ;;  %s3424_s11 = int_to_ptr.vmem [resolvable:$false] %s3423_s11 }
  0x30   : > { %p3421_p11 = pnand %p3419_p10, %p3407_p9  ;;  %s3425_s5 = scalar_lea.vmem %s3424_s11, 4096 }
  0x31   : > { %s414_s3 = scalar_lea.hbm %s5064_s0, %s2735_s2  ;;  %p3426_p13 = scmp.lt.s32.totalorder %s416_s4, %s3424_s11 }
  0x32   : > { %p3422_p12 = pneg %p3421_p11  ;;  %p3427_p0 = scmp.lt.s32.totalorder %s3425_s5, %s3418_s10 }
  0x34   : > { %p3428_p4 = por %p3427_p0, %p3426_p13 }
  0x36   : > { %p3429_p3 = pnand %p3428_p4, %p3422_p12 }
  0x38   : > { %3432 = shalt.err (!%p3429_p3)
}
  0x39   : > { %s3758_s2 = smov 128   ;;  %s3759_s8 = smov 8  }
  0x3a   : > { %3116 = dma.hbm_to_vmem [thread:$0]  (!%p3929_p8), %s414_s3, 2048, %s416_s4, %s3933_s28, %s3758_s2, %s3758_s2, %s3759_s8  }
  0x3b   : > { %s3944_s23 = sadd.s32 4294967295, %s3755_s27   ;;  %s5013_s24 = sadd.s32 4294967294, %s3755_s27  }
  0x3c   : > { %p67_p7 = scmp.ne.s32.totalorder %s3731_s21, %s3727_s20  ;;  %p5009_p9 = scmp.eq.s32.totalorder %s3944_s23, 0 }
  0x3d   : > { %p219_p10 = scmp.ne.s32.totalorder %s3719_s18, %s3715_s17  ;;  %p271_p11 = scmp.eq.s32.totalorder %s3944_s23, 3 }
  0x3e   : > { %p277_p12 = scmp.eq.s32.totalorder %s5013_s24, 3  ;;  %p3957_p8 = por %p5009_p9, %p67_p7 }
  0x3f   : > { %p3963_p13 = por %p219_p10, %p5009_p9  ;;  %p3970_p0 = por %p271_p11, %p61_p1 }
  0x40   : > { %s5066_s3 = scalar_select %p3957_p8, 1, 0 }
  0x41   : > { %s5067_s4 = scalar_select %p3963_p13, 1, 0 }
  0x42   : > { %s5068_s17 = scalar_select %p3970_p0, 1, 0 }
  0x43   : > { %p3974_p4 = por %p277_p12, %p67_p7  ;;  %p2726_p3 = scmp.ge.s32.totalorder %s3755_s27, 1 }
  0x44   : > { %p340_p6 = scmp.lt.s32.totalorder %s3755_s27, 5  ;;  %s3760_s15 = smov [#allocation5]  }
  0x45   : > { %s5069_s30 = scalar_select %p3974_p4, 1, 0 }
  0x46   : > { %p3980_p2 = pnand %p2726_p3, %p340_p6  ;;  %s352_s16 = sshll.u32 %s3760_s15, 4  ;;  %s353_s16 = int_to_ptr.vmem [resolvable:$true] %s352_s16 }
  0x47   : > { %s206_s14 = sadd.s32 1, %s3723_s19  ;;  %p213_p1 = scmp.ne.s32.totalorder %s3723_s19, %s3719_s18 }
  0x48   : > { %p3103_p10 = pneg %p3980_p2  ;;  %s427_s6 = sand.u32 1, %s3723_s19  }
  0x49   : > { %s3999_s11 = scalar_select %p204_p5, %s3723_s19, %s206_s14  }
  0x4a   : > { %p3991_p11 = pnand %p3103_p10, %p5009_p9  ;;  %p5072_p6 = scmp.eq.s32.totalorder %s3755_s27, 0 }
  0x4b   : > { %s3444_s15 = scalar_lea.vmem %s353_s16, 4096  ;;  %p3452_p4 = scmp.lt.s32.totalorder %s353_s16, %s353_s16 }
  0x4c   : > { %p4003_p7 = por %p213_p1, %p5072_p6  ;;  %p3435_p12 = pneg %p3991_p11 }
  0x4d   : > { %p3445_p3 = scmp.ne.s32.totalorder %s353_s16, %s3444_s15  ;;  %p3453_p0 = scmp.lt.s32.totalorder %s3444_s15, %s3444_s15 }
  0x4f   : > { %p3447_p10 = pnand %p3445_p3, %p3435_p12  ;;  %p3454_p13 = por %p3453_p0, %p3452_p4 }
  0x51   : > { %p3448_p9 = pneg %p3447_p10 }
  0x53   : > { %p3455_p8 = pnand %p3454_p13, %p3448_p9 }
  0x55   : > { %3458 = shalt.err (!%p3455_p8)
}
  0x56   : > { %s5074_s1 = sld [smem:[#allocation56_spill]]  ;;  %s4020_s24 = sshll.u32 %s427_s6, 7 }
  0x57   : > { %s2962_s15 = sshll.u32 %s3747_s25, 11  ;;  %s5075_s7 = sld [smem:[#allocation62_spill]] }
  0x58   : > { %s429_s9 = scalar_lea.vmem [#allocation10], %s4020_s24  ;;  %p5076_p5 = scmp.lt.s32.totalorder %s3755_s27, 4 }
  0x59   : > { %s436_s22 = sshll.u32 %s429_s9, 4  ;;  %s3762_s0 = smov [#allocation10]   ;;  %s437_s22 = int_to_ptr.vmem [resolvable:$true] %s436_s22 }
  0x5a   : > { %p4033_p9 = pnand %p5076_p5, %p4003_p7  ;;  %s3472_s14 = scalar_lea.vmem %s437_s22, 2048 }
  0x5b   : > { %p3473_p13 = scmp.ne.s32.totalorder %s437_s22, %s3472_s14  ;;  %s3477_s9 = sshll.u32 %s3762_s0, 4  ;;  %s3478_s9 = int_to_ptr.vmem [resolvable:$false] %s3477_s9 }
  0x5c   : > { %3106 = dma.hbm_to_vmem [thread:$0]  (!%p3991_p11), %s5074_s1, 4096, %s353_s16, [#allocation6], %s3758_s2, %s3758_s2, %s3759_s8  }
  0x5d   : > { %s435_s26 = scalar_lea.hbm %s5075_s7, %s2962_s15  ;;  %s3761_s16 = smov [#allocation7]  }
  0x5e   : > { %s368_s6 = sshll.u32 %s3761_s16, 4  ;;  %p5017_p8 = pneg %p4033_p9  ;;  %s369_s6 = int_to_ptr.vmem [resolvable:$true] %s368_s6 }
  0x5f   : > { %s3479_s29 = scalar_lea.vmem %s3478_s9, 4096  ;;  %p3480_p1 = scmp.lt.s32.totalorder %s437_s22, %s3478_s9 }
  0x60   : > { %p3475_p0 = pnand %p3473_p13, %p5017_p8  ;;  %p3481_p6 = scmp.lt.s32.totalorder %s3479_s29, %s3472_s14 }
  0x62   : > { %p3476_p4 = pneg %p3475_p0  ;;  %p3482_p7 = por %p3481_p6, %p3480_p1 }
  0x64   : > { %p3483_p3 = pnand %p3482_p7, %p3476_p4 }
  0x66   : > { %3486 = shalt.err (!%p3483_p3)
}
  0x67   : > { %3119 = dma.hbm_to_vmem [thread:$0]  (!%p4033_p9), %s435_s26, 2048, %s437_s22, %s3933_s28, %s3758_s2, %s3758_s2, %s3759_s8  }
  0x68   : > { %s3498_s5 = scalar_lea.vmem %s369_s6, 4096  ;;  %p3506_p0 = scmp.lt.s32.totalorder %s369_s6, %s369_s6 }
  0x69   : > { %p3499_p10 = scmp.ne.s32.totalorder %s369_s6, %s3498_s5  ;;  %p3507_p8 = scmp.lt.s32.totalorder %s3498_s5, %s3498_s5 }
  0x6b   : > { %p3501_p5 = pnand %p3499_p10, %p3435_p12  ;;  %p3508_p1 = por %p3507_p8, %p3506_p0 }
  0x6d   : > { %p3502_p13 = pneg %p3501_p5 }
  0x6f   : > { %p3509_p4 = pnand %p3508_p1, %p3502_p13 }
  0x71   : > { %3512 = shalt.err (!%p3509_p4)
}
  0x72   : > { %s5078_s22 = sld [smem:[#allocation58_spill]]  ;;  %s3763_s26 = smov [#allocation8]  }
  0x73   : > { %s384_s0 = sshll.u32 %s3763_s26, 4  ;;  %s5079_s5 = sld [smem:[#allocation63_spill]]  ;;  %s385_s0 = int_to_ptr.vmem [resolvable:$true] %s384_s0 }
  0x74   : > { %s3524_s7 = scalar_lea.vmem %s385_s0, 4096  ;;  %p3532_p3 = scmp.lt.s32.totalorder %s385_s0, %s385_s0 }
  0x75   : > { %p3525_p8 = scmp.ne.s32.totalorder %s385_s0, %s3524_s7  ;;  %p3533_p10 = scmp.lt.s32.totalorder %s3524_s7, %s3524_s7 }
  0x77   : > { %p3527_p6 = pnand %p3525_p8, %p3435_p12  ;;  %p3534_p5 = por %p3533_p10, %p3532_p3 }
  0x78   : > { %3109 = dma.hbm_to_vmem [thread:$0]  (!%p3991_p11), %s5078_s22, 4096, %s369_s6, [#allocation6], %s3758_s2, %s3758_s2, %s3759_s8  }
  0x79   : > { %s4064_s1 = scalar_lea.hbm %s5079_s5, %s2962_s15  ;;  %p3528_p7 = pneg %p3527_p6 }
  0x7b   : > { %p3535_p13 = pnand %p3534_p5, %p3528_p7 }
  0x7d   : > { %3538 = shalt.err (!%p3535_p13)
}
  0x7e   : > { %s5080_s15 = sld [smem:[#allocation60_spill]]  ;;  %s450_s14 = scalar_lea.vmem [#allocation11], %s4020_s24 }
  0x7f   : > { %s457_s22 = sshll.u32 %s450_s14, 4  ;;  %p5081_p0 = pneg %p4033_p9  ;;  %s458_s22 = int_to_ptr.vmem [resolvable:$true] %s457_s22 }
  0x80   : > { %s3552_s26 = scalar_lea.vmem %s458_s22, 2048  ;;  %s3764_s7 = smov [#allocation11]  }
  0x81   : > { %p3553_p12 = scmp.ne.s32.totalorder %s458_s22, %s3552_s26  ;;  %s3557_s10 = sshll.u32 %s3764_s7, 4  ;;  %s3558_s10 = int_to_ptr.vmem [resolvable:$false] %s3557_s10 }
  0x82   : > { %s3559_s9 = scalar_lea.vmem %s3558_s10, 4096  ;;  %p3560_p8 = scmp.lt.s32.totalorder %s458_s22, %s3558_s10 }
  0x83   : > { %p3555_p1 = pnand %p3553_p12, %p5081_p0  ;;  %p3561_p6 = scmp.lt.s32.totalorder %s3559_s9, %s3552_s26 }
  0x84   : > { %3112 = dma.hbm_to_vmem [thread:$0]  (!%p3991_p11), %s5080_s15, 4096, %s385_s0, [#allocation9], %s3758_s2, %s3758_s2, %s3759_s8  }
  0x85   : > { %p3556_p4 = pneg %p3555_p1  ;;  %p3562_p7 = por %p3561_p6, %p3560_p8 }
  0x87   : > { %p3563_p3 = pnand %p3562_p7, %p3556_p4 }
  0x89   : > { %3566 = shalt.err (!%p3563_p3)
}
  0x8a   : > { %3122 = dma.hbm_to_vmem [thread:$0]  (!%p4033_p9), %s4064_s1, 2048, %s458_s22, %s3933_s28, %s3758_s2, %s3758_s2, %s3759_s8  }
  0x8b   : > { %469 = sbr.rel (%p3980_p2) target bundleno = 720 (0x2d0), region = 56 }
  0x90   : > { %s471_s24 = sand.u32 1, %s3944_s23   ;;  %s473_s0 = sand.u32 1, %s3731_s21  }
  0x91   : > { %s4094_s29 = sshll.u32 %s473_s0, 7  ;;  %s472_s12 = scalar_lea.sflag [#allocation3], %s471_s24 }
  0x92   : > { %s4099_s5 = scalar_lea.vmem [#allocation2], %s4094_s29  ;;  %p5082_p11 = scmp.ne.s32.totalorder %s5066_s3, 0 }
  0x94   : > { %3690 = dma.done.wait (%p5082_p11), %s472_s12, 2048  }
  0x95   : > { %3692 = vsyncadd (%p5082_p11), %s472_s12, 4294965248  ;;  %p5083_p2 = scmp.eq.s32.totalorder %s3944_s23, 0 }
  0x97   : > { %3694 = dma.done.wait (%p5083_p2), [#allocation6], 8192   ;;  %p5084_p9 = pmov %p5083_p2 }
  0x98   : > { %p5085_p10 = pmov %p5083_p2 }
  0x99   : > { %3696 = vsyncadd (%p5084_p9), [#allocation6], 4294959104 }
  0x9a   : > { %3698 = dma.done.wait (%p5085_p10), [#allocation9], 4096   ;;  %p5086_p5 = pmov %p5083_p2 }
  0x9b   : > { %s494_s1 = sand.u32 1, %s3719_s18   ;;  %p5087_p13 = scmp.ne.s32.totalorder %s5067_s4, 0 }
  0x9c   : > { %3700 = vsyncadd (%p5086_p5), [#allocation9], 4294963200  ;;  %s4114_s28 = sshll.u32 %s494_s1, 7 }
  0x9d   : > { %s4117_s2 = scalar_lea.vmem [#allocation10], %s4114_s28 }
  0x9e   : > { %3702 = dma.done.wait (%p5087_p13), %s472_s12, 4096  }
  0x9f   : > { %3704 = vsyncadd (%p5087_p13), %s472_s12, 4294963200  ;;  %v3237_v0 = vld [vmem:[#allocation5 + $0x74] ss:$8 sps:$4 sm:$0xff]   ;;  %v3241_v2 = vld [vmem:[#allocation5 + $0x70] ss:$8 sps:$4 sm:$0xff]   ;;  %s5088_s4 = sld [smem:[#allocation57_spill]] }
  0xa0   : > { %v3239_v1 = vld [vmem:[#allocation7 + $0x74] ss:$8 sps:$4 sm:$0xff]   ;;  %870 = vmatprep.subr.bf16.mxu0 %v3237_v0  ;;  %v3242_v3 = vld [vmem:[#allocation7 + $0x70] ss:$8 sps:$4 sm:$0xff]   ;;  %v3243_v4 = vld [vmem:[#allocation5 + $0x64] ss:$8 sps:$4 sm:$0xff]  }
  0xa1   : > { %1187 = vmatprep.subr.bf16.mxu1 %v3239_v1  ;;  %871 = vmatpush1.bf16.msra.mxu0 %v3241_v2  ;;  %v3245_v5 = vld [vmem:[#allocation7 + $0x64] ss:$8 sps:$4 sm:$0xff]   ;;  %v3247_v6 = vld [vmem:[#allocation5 + $0x60] ss:$8 sps:$4 sm:$0xff]   ;;  %v3249_v8 = vld [vmem:[#allocation5 + $0x54] ss:$8 sps:$4 sm:$0xff]  }
  0xa2   : > { %1188 = vmatpush1.bf16.msra.mxu1 %v3242_v3  ;;  %872 = vmatprep.subr.bf16.mxu0 %v3243_v4  ;;  %v3248_v7 = vld [vmem:[#allocation7 + $0x60] ss:$8 sps:$4 sm:$0xff]   ;;  %v3251_v9 = vld [vmem:[#allocation7 + $0x54] ss:$8 sps:$4 sm:$0xff]   ;;  %v3253_v10 = vld [vmem:[#allocation5 + $0x50] ss:$8 sps:$4 sm:$0xff]  }
  0xa3   : > { %1189 = vmatprep.subr.bf16.mxu1 %v3245_v5  ;;  %v3254_v11 = vld [vmem:[#allocation7 + $0x50] ss:$8 sps:$4 sm:$0xff]   ;;  %v3255_v12 = vld [vmem:[#allocation5 + $0x44] ss:$8 sps:$4 sm:$0xff]   ;;  %v3259_v14 = vld [vmem:[#allocation5 + $0x40] ss:$8 sps:$4 sm:$0xff]  }
  0xa4   : > { %v3257_v13 = vld [vmem:[#allocation7 + $0x44] ss:$8 sps:$4 sm:$0xff]   ;;  %v3260_v15 = vld [vmem:[#allocation7 + $0x40] ss:$8 sps:$4 sm:$0xff]   ;;  %v3261_v16 = vld [vmem:[#allocation5 + $0x34] ss:$8 sps:$4 sm:$0xff]  }
  0xa5   : > { %873 = vmatpush1.bf16.msra.mxu0 %v3247_v6  ;;  %v3263_v17 = vld [vmem:[#allocation7 + $0x34] ss:$8 sps:$4 sm:$0xff]   ;;  %v3265_v18 = vld [vmem:[#allocation5 + $0x30] ss:$8 sps:$4 sm:$0xff]   ;;  %v3267_v20 = vld [vmem:[#allocation5 + $0x24] ss:$8 sps:$4 sm:$0xff]  }
  0xa6   : > { %1190 = vmatpush1.bf16.msra.mxu1 %v3248_v7  ;;  %874 = vmatprep.subr.bf16.mxu0 %v3249_v8  ;;  %v3266_v19 = vld [vmem:[#allocation7 + $0x30] ss:$8 sps:$4 sm:$0xff]   ;;  %v3269_v21 = vld [vmem:[#allocation7 + $0x24] ss:$8 sps:$4 sm:$0xff]   ;;  %v3271_v22 = vld [vmem:[#allocation5 + $0x20] ss:$8 sps:$4 sm:$0xff]  }
  0xa7   : > { %1191 = vmatprep.subr.bf16.mxu1 %v3251_v9  ;;  %v3272_v23 = vld [vmem:[#allocation7 + $0x20] ss:$8 sps:$4 sm:$0xff]   ;;  %v3273_v24 = vld [vmem:[#allocation5 + $0x14] ss:$8 sps:$4 sm:$0xff]   ;;  %v3277_v26 = vld [vmem:[#allocation5 + $0x10] ss:$8 sps:$4 sm:$0xff]  }
  0xa8   : > { %v3275_v25 = vld [vmem:[#allocation7 + $0x14] ss:$8 sps:$4 sm:$0xff]   ;;  %v3278_v27 = vld [vmem:[#allocation7 + $0x10] ss:$8 sps:$4 sm:$0xff]   ;;  %v3279_v28 = vld [vmem:[#allocation5 + $0x4] ss:$8 sps:$4 sm:$0xff]  }
  0xa9   : > { %875 = vmatpush1.bf16.msra.mxu0 %v3253_v10  ;;  %v3281_v29 = vld [vmem:[#allocation7 + $0x4] ss:$8 sps:$4 sm:$0xff]   ;;  %v3283_v30 = vld [vmem:[#allocation5] ss:$8 sps:$4 sm:$0xff]   ;;  %v3285_v32 = vld [vmem:[#allocation5 + $0xf4] ss:$8 sps:$4 sm:$0xff]  }
  0xaa   : > { %1192 = vmatpush1.bf16.msra.mxu1 %v3254_v11  ;;  %876 = vmatprep.subr.bf16.mxu0 %v3255_v12  ;;  %v3284_v31 = vld [vmem:[#allocation7] ss:$8 sps:$4 sm:$0xff]   ;;  %v3287_v33 = vld [vmem:[#allocation7 + $0xf4] ss:$8 sps:$4 sm:$0xff]   ;;  %v3289_v34 = vld [vmem:[#allocation5 + $0xf0] ss:$8 sps:$4 sm:$0xff]  }
  0xab   : > { %1193 = vmatprep.subr.bf16.mxu1 %v3257_v13  ;;  %v3290_v35 = vld [vmem:[#allocation7 + $0xf0] ss:$8 sps:$4 sm:$0xff]   ;;  %v3291_v36 = vld [vmem:[#allocation5 + $0xe4] ss:$8 sps:$4 sm:$0xff]   ;;  %v3295_v38 = vld [vmem:[#allocation5 + $0xe0] ss:$8 sps:$4 sm:$0xff]  }
  0xac   : > { %v3293_v37 = vld [vmem:[#allocation7 + $0xe4] ss:$8 sps:$4 sm:$0xff]   ;;  %v3296_v39 = vld [vmem:[#allocation7 + $0xe0] ss:$8 sps:$4 sm:$0xff]   ;;  %v3297_v40 = vld [vmem:[#allocation5 + $0xd4] ss:$8 sps:$4 sm:$0xff]  }
  0xad   : > { %877 = vmatpush1.bf16.msra.mxu0 %v3259_v14  ;;  %v3299_v41 = vld [vmem:[#allocation7 + $0xd4] ss:$8 sps:$4 sm:$0xff]   ;;  %v3301_v42 = vld [vmem:[#allocation5 + $0xd0] ss:$8 sps:$4 sm:$0xff]   ;;  %v3303_v44 = vld [vmem:[#allocation5 + $0xc4] ss:$8 sps:$4 sm:$0xff]  }
  0xae   : > { %1194 = vmatpush1.bf16.msra.mxu1 %v3260_v15  ;;  %878 = vmatprep.subr.bf16.mxu0 %v3261_v16  ;;  %v3302_v43 = vld [vmem:[#allocation7 + $0xd0] ss:$8 sps:$4 sm:$0xff]   ;;  %v3305_v45 = vld [vmem:[#allocation7 + $0xc4] ss:$8 sps:$4 sm:$0xff]   ;;  %v3307_v46 = vld [vmem:[#allocation5 + $0xc0] ss:$8 sps:$4 sm:$0xff]  }
  0xaf   : > { %1195 = vmatprep.subr.bf16.mxu1 %v3263_v17  ;;  %v3308_v47 = vld [vmem:[#allocation7 + $0xc0] ss:$8 sps:$4 sm:$0xff]   ;;  %v4124_v48 = vld [vmem:[%s4099_s5 + $0x4] ss:$8 sps:$4 sm:$0xff]   ;;  %v3309_v49 = vld [vmem:[#allocation5 + $0xb4] ss:$8 sps:$4 sm:$0xff]  }
  0xb0   : > { %v3311_v50 = vld [vmem:[#allocation7 + $0xb4] ss:$8 sps:$4 sm:$0xff]   ;;  %902 = vmatprep.mubr.bf16.mxu0 %v4124_v48  ;;  %1219 = vmatprep.mubr.bf16.mxu1 %v4124_v48  ;;  %v3313_v51 = vld [vmem:[#allocation5 + $0xb0] ss:$8 sps:$4 sm:$0xff]   ;;  %v3315_v53 = vld [vmem:[#allocation5 + $0xa4] ss:$8 sps:$4 sm:$0xff]  }
  0xb1   : > { %879 = vmatpush1.bf16.msra.mxu0 %v3265_v18  ;;  %v3314_v52 = vld [vmem:[#allocation7 + $0xb0] ss:$8 sps:$4 sm:$0xff]   ;;  %v3317_v54 = vld [vmem:[#allocation7 + $0xa4] ss:$8 sps:$4 sm:$0xff]   ;;  %v3319_v55 = vld [vmem:[#allocation5 + $0xa0] ss:$8 sps:$4 sm:$0xff]  }
  0xb2   : > { %1196 = vmatpush1.bf16.msra.mxu1 %v3266_v19  ;;  %880 = vmatprep.subr.bf16.mxu0 %v3267_v20  ;;  %v3320_v56 = vld [vmem:[#allocation7 + $0xa0] ss:$8 sps:$4 sm:$0xff]   ;;  %v3321_v57 = vld [vmem:[#allocation5 + $0x94] ss:$8 sps:$4 sm:$0xff]   ;;  %v3325_v59 = vld [vmem:[#allocation5 + $0x90] ss:$8 sps:$4 sm:$0xff]  }
  0xb3   : > { %1197 = vmatprep.subr.bf16.mxu1 %v3269_v21  ;;  %v3323_v58 = vld [vmem:[#allocation7 + $0x94] ss:$8 sps:$4 sm:$0xff]   ;;  %v3326_v60 = vld [vmem:[#allocation7 + $0x90] ss:$8 sps:$4 sm:$0xff]   ;;  %v3327_v61 = vld [vmem:[#allocation5 + $0x84] ss:$8 sps:$4 sm:$0xff]  }
  0xb4   : > { %v3329_v62 = vld [vmem:[#allocation7 + $0x84] ss:$8 sps:$4 sm:$0xff]   ;;  %v3331_v63 = vld [vmem:[#allocation5 + $0x80] ss:$8 sps:$4 sm:$0xff]   ;;  %v3359_v1 = vld [vmem:[#allocation8 + $0x74] ss:$8 sps:$4 sm:$0xff]  }
  0xb5   : > { %881 = vmatpush1.bf16.msra.mxu0 %v3271_v22  ;;  %v3332_v0 = vld [vmem:[#allocation7 + $0x80] ss:$8 sps:$4 sm:$0xff]   ;;  %v4132_v3 = vld [vmem:[%s4099_s5 + $0x14] ss:$8 sps:$4 sm:$0xff]   ;;  %v3357_v4 = vld [vmem:[#allocation8 + $0x70] ss:$8 sps:$4 sm:$0xff]  }
  0xb6   : > { %1198 = vmatpush1.bf16.msra.mxu1 %v3272_v23  ;;  %882 = vmatprep.subr.bf16.mxu0 %v3273_v24  ;;  %v4129_v2 = vld [vmem:[%s4099_s5] ss:$8 sps:$4 sm:$0xff]   ;;  %v3362_v5 = vld [vmem:[#allocation8 + $0x64] ss:$8 sps:$4 sm:$0xff]   ;;  %v4139_v6 = vld [vmem:[%s4099_s5 + $0x10] ss:$8 sps:$4 sm:$0xff]  }
  0xb7   : > { %1199 = vmatprep.subr.bf16.mxu1 %v3275_v25  ;;  %v3360_v7 = vld [vmem:[#allocation8 + $0x60] ss:$8 sps:$4 sm:$0xff]   ;;  %v3365_v8 = vld [vmem:[#allocation8 + $0x54] ss:$8 sps:$4 sm:$0xff]   ;;  %v4142_v9 = vld [vmem:[%s4099_s5 + $0x24] ss:$8 sps:$4 sm:$0xff]  }
  0xb8   : > { %v3363_v10 = vld [vmem:[#allocation8 + $0x50] ss:$8 sps:$4 sm:$0xff]   ;;  %v3368_v11 = vld [vmem:[#allocation8 + $0x44] ss:$8 sps:$4 sm:$0xff]   ;;  %v3366_v12 = vld [vmem:[#allocation8 + $0x40] ss:$8 sps:$4 sm:$0xff]  }
  0xb9   : > { %883 = vmatpush1.bf16.msra.mxu0 %v3277_v26  ;;  %v3371_v13 = vld [vmem:[#allocation8 + $0x34] ss:$8 sps:$4 sm:$0xff]   ;;  %v4149_v14 = vld [vmem:[%s4099_s5 + $0x20] ss:$8 sps:$4 sm:$0xff]   ;;  %v3369_v16 = vld [vmem:[#allocation8 + $0x30] ss:$8 sps:$4 sm:$0xff]  }
  0xba   : > { %1200 = vmatpush1.bf16.msra.mxu1 %v3278_v27  ;;  %884 = vmatprep.subr.bf16.mxu0 %v3279_v28  ;;  %v4152_v15 = vld [vmem:[%s4099_s5 + $0x34] ss:$8 sps:$4 sm:$0xff]   ;;  %v3374_v17 = vld [vmem:[#allocation8 + $0x24] ss:$8 sps:$4 sm:$0xff]   ;;  %v3372_v18 = vld [vmem:[#allocation8 + $0x20] ss:$8 sps:$4 sm:$0xff]  }
  0xbb   : > { %1201 = vmatprep.subr.bf16.mxu1 %v3281_v29  ;;  %v3377_v19 = vld [vmem:[#allocation8 + $0x14] ss:$8 sps:$4 sm:$0xff]   ;;  %v4159_v20 = vld [vmem:[%s4099_s5 + $0x30] ss:$8 sps:$4 sm:$0xff]   ;;  %v4162_v21 = vld [vmem:[%s4099_s5 + $0x44] ss:$8 sps:$4 sm:$0xff]  }
  0xbc   : > { %v3375_v22 = vld [vmem:[#allocation8 + $0x10] ss:$8 sps:$4 sm:$0xff]   ;;  %v3380_v23 = vld [vmem:[#allocation8 + $0x4] ss:$8 sps:$4 sm:$0xff]   ;;  %v3378_v24 = vld [vmem:[#allocation8] ss:$8 sps:$4 sm:$0xff]  }
  0xbd   : > { %885 = vmatpush1.bf16.msra.mxu0 %v3283_v30  ;;  %v3383_v25 = vld [vmem:[#allocation8 + $0xf4] ss:$8 sps:$4 sm:$0xff]   ;;  %v4169_v26 = vld [vmem:[%s4099_s5 + $0x40] ss:$8 sps:$4 sm:$0xff]   ;;  %v3381_v28 = vld [vmem:[#allocation8 + $0xf0] ss:$8 sps:$4 sm:$0xff]  }
  0xbe   : > { %1202 = vmatpush1.bf16.msra.mxu1 %v3284_v31  ;;  %886 = vmatprep.subr.bf16.mxu0 %v3285_v32  ;;  %v4172_v27 = vld [vmem:[%s4099_s5 + $0x54] ss:$8 sps:$4 sm:$0xff]   ;;  %v3386_v29 = vld [vmem:[#allocation8 + $0xe4] ss:$8 sps:$4 sm:$0xff]   ;;  %v3384_v30 = vld [vmem:[#allocation8 + $0xe0] ss:$8 sps:$4 sm:$0xff]  }
  0xbf   : > { %1203 = vmatprep.subr.bf16.mxu1 %v3287_v33  ;;  %v3389_v31 = vld [vmem:[#allocation8 + $0xd4] ss:$8 sps:$4 sm:$0xff]   ;;  %v3350_v32 = vld [vmem:[%s4099_s5 + $0x50] ss:$8 sps:$4 sm:$0xff]   ;;  %v3351_v33 = vld [vmem:[%s4099_s5 + $0x64] ss:$8 sps:$4 sm:$0xff]  }
  0xc0   : > { %s5089_s16 = sld [smem:[#allocation59_spill]]  ;;  %s3765_s15 = smov 64  }
  0xc1   : > { %887 = vmatpush2.bf16.msra.mxu0 %v3289_v34  ;;  %v3387_v34 = vld [vmem:[#allocation8 + $0xd0] ss:$8 sps:$4 sm:$0xff]   ;;  %s5115_s26 = sld [smem:[#allocation61_spill]]  ;;  %s4522_s7 = scalar_lea.vmem [#allocation15], %s4094_s29 }
  0xc2   : > { %1204 = vmatpush2.bf16.msra.mxu1 %v3290_v35  ;;  %888 = vmatprep.subr.bf16.mxu0 %v3291_v36  ;;  %v3392_v35 = vld [vmem:[#allocation8 + $0xc4] ss:$8 sps:$4 sm:$0xff]   ;;  %v3390_v36 = vld [vmem:[#allocation8 + $0xc0] ss:$8 sps:$4 sm:$0xff]   ;;  %s4632_s10 = scalar_lea.vmem [#allocation11], %s4114_s28  ;;  %s4673_s9 = scalar_lea.vmem [#allocation12], %s4094_s29 }
  0xc3   : > { %1205 = vmatprep.subr.bf16.mxu1 %v3293_v37  ;;  %v3353_v37 = vld [vmem:[%s4099_s5 + $0x60] ss:$8 sps:$4 sm:$0xff]   ;;  %s4685_s12 = scalar_lea.vmem [#allocation13], %s4094_s29  ;;  %s5143_s29 = sld [smem:[#allocation23_spill]] }
  0xc4   : > { %s2460_s3 = sshll.u32 %s4673_s9, 4  ;;  %s5145_s6 = sld [smem:[#allocation64_spill]]  ;;  %s4844_s3 = int_to_ptr.vmem [resolvable:$true] %s2460_s3 }
  0xc5   : > { %889 = vmatpush2.bf16.msra.mxu0 %v3295_v38  ;;  %v3354_v38 = vld [vmem:[%s4099_s5 + $0x74] ss:$8 sps:$4 sm:$0xff]   ;;  %s2498_s14 = sshll.u32 %s4522_s7, 4  ;;  %s4852_s22 = scalar_lea.sflag [#allocation4], %s473_s0  ;;  %s4897_s14 = int_to_ptr.vmem [resolvable:$true] %s2498_s14 }
  0xc6   : > { %1206 = vmatpush2.bf16.msra.mxu1 %v3296_v39  ;;  %890 = vmatprep.subr.bf16.mxu0 %v3297_v40  ;;  %v3356_v39 = vld [vmem:[%s4099_s5 + $0x70] ss:$8 sps:$4 sm:$0xff]   ;;  %v3395_v40 = vld [vmem:[#allocation8 + $0xb4] ss:$8 sps:$4 sm:$0xff]   ;;  %s5144_s5 = sld [smem:[#allocation24_spill]]  ;;  %p5146_p0 = scmp.ne.s32.totalorder %s5068_s17, 0 }
  0xc7   : > { %1207 = vmatprep.subr.bf16.mxu1 %v3299_v41  ;;  %v3393_v41 = vld [vmem:[#allocation8 + $0xb0] ss:$8 sps:$4 sm:$0xff]  }
  0xc9   : > { %891 = vmatpush2.bf16.msra.mxu0 %v3301_v42  ;;  %v3398_v42 = vld [vmem:[#allocation8 + $0xa4] ss:$8 sps:$4 sm:$0xff]   ;;  %s3044_s1 = sshll.u32 %s5143_s29, 5 }
  0xca   : > { %1208 = vmatpush2.bf16.msra.mxu1 %v3302_v43  ;;  %892 = vmatprep.subr.bf16.mxu0 %v3303_v44  ;;  %v3396_v43 = vld [vmem:[#allocation8 + $0xa0] ss:$8 sps:$4 sm:$0xff]   ;;  %v3401_v44 = vld [vmem:[#allocation8 + $0x94] ss:$8 sps:$4 sm:$0xff]  }
  0xcb   : > { %1209 = vmatprep.subr.bf16.mxu1 %v3305_v45  ;;  %v3399_v45 = vld [vmem:[#allocation8 + $0x90] ss:$8 sps:$4 sm:$0xff]  }
  0xcc   : > { %s2949_s28 = sshll.u32 %s5144_s5, 6 }
  0xcd   : > { %893 = vmatpush2.bf16.msra.mxu0 %v3307_v46  ;;  %v3404_v46 = vld [vmem:[#allocation8 + $0x84] ss:$8 sps:$4 sm:$0xff]  }
  0xce   : > { %1210 = vmatpush2.bf16.msra.mxu1 %v3308_v47  ;;  %894 = vmatprep.subr.bf16.mxu0 %v3309_v49  ;;  %v3402_v47 = vld [vmem:[#allocation8 + $0x80] ss:$8 sps:$4 sm:$0xff]  }
  0xcf   : > { %1211 = vmatprep.subr.bf16.mxu1 %v3311_v50 }
  0xd1   : > { %895 = vmatpush2.bf16.msra.mxu0 %v3313_v51  ;;  %v618_v51 = vld [vmem:[%s5088_s4] sm:$0x3] }
  0xd2   : > { %1212 = vmatpush2.bf16.msra.mxu1 %v3314_v52  ;;  %896 = vmatprep.subr.bf16.mxu0 %v3315_v53 }
  0xd3   : > { %1213 = vmatprep.subr.bf16.mxu1 %v3317_v54  ;;  %v1015_v54 = vld [vmem:[%s5089_s16] sm:$0x3] }
  0xd5   : > { %897 = vmatpush2.bf16.msra.mxu0 %v3319_v55 }
  0xd6   : > { %1214 = vmatpush2.bf16.msra.mxu1 %v3320_v56  ;;  %898 = vmatprep.subr.bf16.mxu0 %v3321_v57 }
  0xd7   : > { %1215 = vmatprep.subr.bf16.mxu1 %v3323_v58 }
  0xd9   : > { %899 = vmatpush2.bf16.msra.mxu0 %v3325_v59 }
  0xda   : > { %1216 = vmatpush2.bf16.msra.mxu1 %v3326_v60  ;;  %900 = vmatprep.subr.bf16.mxu0 %v3327_v61 }
  0xdb   : > { %1217 = vmatprep.subr.bf16.mxu1 %v3329_v62 }
  0xdd   : > { %901 = vmatpush2.bf16.msra.mxu0 %v3331_v63 }
  0xde   : > { %1218 = vmatpush2.bf16.msra.mxu1 %v3332_v0  ;;  %1504 = vmatprep.subr.bf16.mxu0 %v3359_v1 }
  0xdf   : > { %3047 = vmatprep.subr.bf16.mxu1 %v3359_v1 }
  0xe0   : > { %903 = vmatmul.mubr.bf16.vlgmr.msra.gmra.mxu0 %v4129_v2 }
  0xe1   : > { %1220 = vmatmul.mubr.bf16.vlgmr.msra.gmra.mxu1 %v4129_v2  ;;  %912 = vmatprep.mubr.bf16.mxu0 %v4132_v3 }
  0xe2   : > { %1229 = vmatprep.mubr.bf16.mxu1 %v4132_v3  ;;  %1505 = vmatpush1.bf16.msra.mxu0 %v3357_v4 }
  0xe3   : > { %3063 = vmatpush1.bf16.msra.mxu1 %v3357_v4  ;;  %1506 = vmatprep.subr.bf16.mxu0 %v3362_v5 }
  0xe4   : > { %3048 = vmatprep.subr.bf16.mxu1 %v3362_v5 }
  0xe6   : > { %1507 = vmatpush1.bf16.msra.mxu0 %v3360_v7 }
  0xe7   : > { %3064 = vmatpush1.bf16.msra.mxu1 %v3360_v7  ;;  %1508 = vmatprep.subr.bf16.mxu0 %v3365_v8 }
  0xe8   : > { %3049 = vmatprep.subr.bf16.mxu1 %v3365_v8  ;;  %913 = vmatmul.mubr.bf16.gmra.mxu0 %v4139_v6 }
  0xe9   : > { %1230 = vmatmul.mubr.bf16.gmra.mxu1 %v4139_v6  ;;  %922 = vmatprep.mubr.bf16.mxu0 %v4142_v9 }
  0xea   : > { %1239 = vmatprep.mubr.bf16.mxu1 %v4142_v9  ;;  %1509 = vmatpush1.bf16.msra.mxu0 %v3363_v10 }
  0xeb   : > { %3065 = vmatpush1.bf16.msra.mxu1 %v3363_v10  ;;  %1510 = vmatprep.subr.bf16.mxu0 %v3368_v11 }
  0xec   : > { %3050 = vmatprep.subr.bf16.mxu1 %v3368_v11 }
  0xee   : > { %1511 = vmatpush1.bf16.msra.mxu0 %v3366_v12 }
  0xef   : > { %3066 = vmatpush1.bf16.msra.mxu1 %v3366_v12  ;;  %1512 = vmatprep.subr.bf16.mxu0 %v3371_v13 }
  0xf0   : > { %3051 = vmatprep.subr.bf16.mxu1 %v3371_v13  ;;  %923 = vmatmul.mubr.bf16.gmra.mxu0 %v4149_v14 }
  0xf1   : > { %1240 = vmatmul.mubr.bf16.gmra.mxu1 %v4149_v14  ;;  %932 = vmatprep.mubr.bf16.mxu0 %v4152_v15 }
  0xf2   : > { %1249 = vmatprep.mubr.bf16.mxu1 %v4152_v15  ;;  %1513 = vmatpush1.bf16.msra.mxu0 %v3369_v16 }
  0xf3   : > { %3067 = vmatpush1.bf16.msra.mxu1 %v3369_v16  ;;  %1514 = vmatprep.subr.bf16.mxu0 %v3374_v17 }
  0xf4   : > { %3052 = vmatprep.subr.bf16.mxu1 %v3374_v17 }
  0xf6   : > { %1515 = vmatpush1.bf16.msra.mxu0 %v3372_v18 }
  0xf7   : > { %3068 = vmatpush1.bf16.msra.mxu1 %v3372_v18  ;;  %1516 = vmatprep.subr.bf16.mxu0 %v3377_v19 }
  0xf8   : > { %3053 = vmatprep.subr.bf16.mxu1 %v3377_v19  ;;  %933 = vmatmul.mubr.bf16.gmra.mxu0 %v4159_v20 }
  0xf9   : > { %1250 = vmatmul.mubr.bf16.gmra.mxu1 %v4159_v20  ;;  %942 = vmatprep.mubr.bf16.mxu0 %v4162_v21 }
  0xfa   : > { %1259 = vmatprep.mubr.bf16.mxu1 %v4162_v21  ;;  %1517 = vmatpush1.bf16.msra.mxu0 %v3375_v22 }
  0xfb   : > { %3069 = vmatpush1.bf16.msra.mxu1 %v3375_v22  ;;  %1518 = vmatprep.subr.bf16.mxu0 %v3380_v23 }
  0xfc   : > { %3054 = vmatprep.subr.bf16.mxu1 %v3380_v23 }
  0xfe   : > { %1519 = vmatpush1.bf16.msra.mxu0 %v3378_v24 }
  0xff   : > { %3070 = vmatpush1.bf16.msra.mxu1 %v3378_v24  ;;  %1520 = vmatprep.subr.bf16.mxu0 %v3383_v25 }
 0x100   : > { %3055 = vmatprep.subr.bf16.mxu1 %v3383_v25  ;;  %943 = vmatmul.mubr.bf16.gmra.mxu0 %v4169_v26 }
 0x101   : > { %1260 = vmatmul.mubr.bf16.gmra.mxu1 %v4169_v26  ;;  %952 = vmatprep.mubr.bf16.mxu0 %v4172_v27 }
 0x102   : > { %1269 = vmatprep.mubr.bf16.mxu1 %v4172_v27  ;;  %1521 = vmatpush2.bf16.msra.mxu0 %v3381_v28 }
 0x103   : > { %3071 = vmatpush2.bf16.msra.mxu1 %v3381_v28  ;;  %1522 = vmatprep.subr.bf16.mxu0 %v3386_v29 }
 0x104   : > { %3056 = vmatprep.subr.bf16.mxu1 %v3386_v29 }
 0x106   : > { %1523 = vmatpush2.bf16.msra.mxu0 %v3384_v30 }
 0x107   : > { %3072 = vmatpush2.bf16.msra.mxu1 %v3384_v30  ;;  %1524 = vmatprep.subr.bf16.mxu0 %v3389_v31 }
 0x108   : > { %3057 = vmatprep.subr.bf16.mxu1 %v3389_v31  ;;  %953 = vmatmul.mubr.bf16.gmra.mxu0 %v3350_v32 }
 0x109   : > { %1270 = vmatmul.mubr.bf16.gmra.mxu1 %v3350_v32  ;;  %962 = vmatprep.mubr.bf16.mxu0 %v3351_v33 }
 0x10a   : > { %1279 = vmatprep.mubr.bf16.mxu1 %v3351_v33  ;;  %1525 = vmatpush2.bf16.msra.mxu0 %v3387_v34 }
 0x10b   : > { %3073 = vmatpush2.bf16.msra.mxu1 %v3387_v34  ;;  %1526 = vmatprep.subr.bf16.mxu0 %v3392_v35 }
 0x10c   : > { %3058 = vmatprep.subr.bf16.mxu1 %v3392_v35 }
 0x10e   : > { %1527 = vmatpush2.bf16.msra.mxu0 %v3390_v36 }
 0x10f   : > { %3074 = vmatpush2.bf16.msra.mxu1 %v3390_v36  ;;  %1528 = vmatprep.subr.bf16.mxu0 %v3395_v40 }
 0x110   : > { %963 = vmatmul.mubr.bf16.gmra.mxu0 %v3353_v37  ;;  %3059 = vmatprep.subr.bf16.mxu1 %v3395_v40 }
 0x111   : > { %1280 = vmatmul.mubr.bf16.gmra.mxu1 %v3353_v37  ;;  %972 = vmatprep.mubr.bf16.mxu0 %v3354_v38 }
 0x112   : > { %1289 = vmatprep.mubr.bf16.mxu1 %v3354_v38  ;;  %1529 = vmatpush2.bf16.msra.mxu0 %v3393_v41 }
 0x113   : > { %3075 = vmatpush2.bf16.msra.mxu1 %v3393_v41  ;;  %1530 = vmatprep.subr.bf16.mxu0 %v3398_v42 }
 0x114   : > { %3060 = vmatprep.subr.bf16.mxu1 %v3398_v42 }
 0x116   : > { %1531 = vmatpush2.bf16.msra.mxu0 %v3396_v43 }
 0x117   : > { %3076 = vmatpush2.bf16.msra.mxu1 %v3396_v43  ;;  %1532 = vmatprep.subr.bf16.mxu0 %v3401_v44 }
 0x118   : > { %973 = vmatmul.mubr.bf16.gmra.mxu0 %v3356_v39  ;;  %3061 = vmatprep.subr.bf16.mxu1 %v3401_v44 }
 0x119   : > { %1290 = vmatmul.mubr.bf16.gmra.mxu1 %v3356_v39  ;;  %1536 = vmatprep.mubr.bf16.mxu0 %v4124_v48  ;;  %v620_v48 = vlaneseq }
 0x11a   : > { %1576 = vmatprep.mubr.bf16.mxu1 %v4162_v21  ;;  %1533 = vmatpush2.bf16.msra.mxu0 %v3399_v45 }
 0x11b   : > { %3077 = vmatpush2.bf16.msra.mxu1 %v3399_v45  ;;  %1534 = vmatprep.subr.bf16.mxu0 %v3404_v46  ;;  %v621_v49 = vshrl.u32 %v620_v48, 7 }
 0x11c   : > { %3062 = vmatprep.subr.bf16.mxu1 %v3404_v46 }
 0x11d   : > { %v4194_v50 = vsub.s32 0, %v621_v49  ;;  %v4199_v52 = vsub.s32 1, %v621_v49 }
 0x11e   : > { %1535 = vmatpush2.bf16.msra.mxu0 %v3402_v47 }
 0x11f   : > { %3078 = vmatpush2.bf16.msra.mxu1 %v3402_v47  ;;  %v4202_v53 = vrot.slane %v618_v51, %v4194_v50  ;;  %v4208_v55 = vrot.slane %v618_v51, %v4199_v52  ;;  %v4214_v59 = vrot.slane %v1015_v54, %v4194_v50 }
 0x121   : > { %1537 = vmatmul.mubr.bf16.vlgmr.msra.gmra.mxu0 %v4129_v2  ;;  %v4225_v2 = vrot.slane %v1015_v54, %v4199_v52 }
 0x122   : > { %1577 = vmatmul.mubr.bf16.vlgmr.msra.gmra.mxu1 %v4169_v26  ;;  %1546 = vmatprep.mubr.bf16.mxu0 %v4132_v3 }
 0x123   : > { %1586 = vmatprep.mubr.bf16.mxu1 %v4172_v27 }
 0x129   : > { %1547 = vmatmul.mubr.bf16.gmra.mxu0 %v4139_v6 }
 0x12a   : > { %1587 = vmatmul.mubr.bf16.gmra.mxu1 %v3350_v32  ;;  %1556 = vmatprep.mubr.bf16.mxu0 %v4142_v9 }
 0x12b   : > { %1596 = vmatprep.mubr.bf16.mxu1 %v3351_v33 }
 0x131   : > { %1557 = vmatmul.mubr.bf16.gmra.mxu0 %v4149_v14 }
 0x132   : > { %1597 = vmatmul.mubr.bf16.gmra.mxu1 %v3353_v37  ;;  %1566 = vmatprep.mubr.bf16.mxu0 %v4152_v15 }
 0x133   : > { %1606 = vmatprep.mubr.bf16.mxu1 %v3354_v38 }
 0x139   : > { %1567 = vmatmul.mubr.bf16.gmra.mxu0 %v4159_v20 }
 0x13a   : > { %1607 = vmatmul.mubr.bf16.gmra.mxu1 %v3356_v39 }
 0x1a0   : > { %v904_v56 = vpop.f32.mrf.mxu0 }
 0x1a1   : > { %v1221_v57 = vpop.f32.mrf.mxu1  ;;  %v4211_v58 = vadd.f32 %v904_v56, %v4202_v53 }
 0x1a2   : > { %v906_v60 = vpop.f32.mrf.mxu0  ;;  %v4222_v1 = vadd.f32 %v1221_v57, %v4214_v59 }
 0x1a3   : > { %v1223_v61 = vpop.f32.mrf.mxu1  ;;  %v4217_v62 = vadd.f32 %v906_v60, %v4208_v55  ;;  %1665 = vrot.lane.b32.xlu0 %v4211_v58, %s3765_s15 }
 0x1a4   : > { %v908_v63 = vpop.f32.mrf.mxu0  ;;  %v4235_v8 = vadd.f32 %v1223_v61, %v4225_v2 }
 0x1a5   : > { %v1225_v0 = vpop.f32.mrf.mxu1  ;;  %2001 = vrot.lane.b32.xlu1 %v4217_v62, %s3765_s15  ;;  %v4245_v14 = vadd.f32 %v908_v63, %v4202_v53 }
 0x1a6   : > { %v910_v3 = vpop.f32.mrf.mxu0  ;;  %v4230_v5 = vadd.f32 %v1225_v0, %v4214_v59 }
 0x1a7   : > { %v1227_v4 = vpop.f32.mrf.mxu1  ;;  %1745 = vrot.lane.b32.xlu0 %v4222_v1, %s3765_s15  ;;  %v4255_v20 = vadd.f32 %v910_v3, %v4208_v55 }
 0x1a8   : > { %v914_v6 = vpop.f32.mrf.mxu0  ;;  %v4240_v11 = vadd.f32 %v1227_v4, %v4225_v2 }
 0x1a9   : > { %v1231_v7 = vpop.f32.mrf.mxu1  ;;  %1747 = vrot.lane.b32.xlu1 %v4230_v5, %s3765_s15  ;;  %v4248_v15 = vadd.f32 %v914_v6, %v4202_v53 }
 0x1aa   : > { %v916_v9 = vpop.f32.mrf.mxu0  ;;  %v4263_v24 = vadd.f32 %v1231_v7, %v4214_v59 }
 0x1ab   : > { %v1233_v10 = vpop.f32.mrf.mxu1  ;;  %2081 = vrot.lane.b32.xlu0 %v4235_v8, %s3765_s15  ;;  %v4260_v23 = vadd.f32 %v916_v9, %v4208_v55 }
 0x1ac   : > { %v918_v12 = vpop.f32.mrf.mxu0  ;;  %v4275_v32 = vadd.f32 %v1233_v10, %v4225_v2 }
 0x1ad   : > { %v1235_v13 = vpop.f32.mrf.mxu1  ;;  %2083 = vrot.lane.b32.xlu1 %v4240_v11, %s3765_s15  ;;  %v4270_v29 = vadd.f32 %v918_v12, %v4202_v53 }
 0x1ae   : > { %v920_v16 = vpop.f32.mrf.mxu0  ;;  %v4280_v35 = vadd.f32 %v1235_v13, %v4214_v59 }
 0x1af   : > { %v1237_v17 = vpop.f32.mrf.mxu1  ;;  %1667 = vrot.lane.b32.xlu0 %v4245_v14, %s3765_s15  ;;  %v4285_v38 = vadd.f32 %v920_v16, %v4208_v55 }
 0x1b0   : > { %v924_v18 = vpop.f32.mrf.mxu0  ;;  %v4290_v41 = vadd.f32 %v1237_v17, %v4225_v2 }
 0x1b1   : > { %v1241_v19 = vpop.f32.mrf.mxu1  ;;  %1669 = vrot.lane.b32.xlu1 %v4248_v15, %s3765_s15  ;;  %v4293_v42 = vadd.f32 %v924_v18, %v4202_v53 }
 0x1b2   : > { %v926_v21 = vpop.f32.mrf.mxu0  ;;  %v4305_v48 = vadd.f32 %v1241_v19, %v4214_v59 }
 0x1b3   : > { %v1243_v22 = vpop.f32.mrf.mxu1  ;;  %2003 = vrot.lane.b32.xlu0 %v4255_v20, %s3765_s15  ;;  %v4302_v47 = vadd.f32 %v926_v21, %v4208_v55 }
 0x1b4   : > { %v928_v25 = vpop.f32.mrf.mxu0  ;;  %5090 = vst [vmem:[#allocation29_spill] sm:$0xff] %v4305_v48  ;;  %v4321_v63 = vadd.f32 %v1243_v22, %v4225_v2 }
 0x1b5   : > { %v1245_v26 = vpop.f32.mrf.mxu1  ;;  %2005 = vrot.lane.b32.xlu1 %v4260_v23, %s3765_s15  ;;  %v4314_v57 = vadd.f32 %v928_v25, %v4202_v53 }
 0x1b6   : > { %v930_v27 = vpop.f32.mrf.mxu0  ;;  %5092 = vst [vmem:[#allocation31_spill] sm:$0xff] %v4321_v63  ;;  %v4326_v0 = vadd.f32 %v1245_v26, %v4214_v59 }
 0x1b7   : > { %v1247_v28 = vpop.f32.mrf.mxu1  ;;  %1749 = vrot.lane.b32.xlu0 %v4263_v24, %s3765_s15  ;;  %5091 = vst [vmem:[#allocation30_spill] sm:$0xff] %v4314_v57  ;;  %v4333_v6 = vadd.f32 %v930_v27, %v4208_v55 }
 0x1b8   : > { %v934_v30 = vpop.f32.mrf.mxu0  ;;  %5093 = vst [vmem:[#allocation32_spill] sm:$0xff] %v4326_v0  ;;  %v4338_v7 = vadd.f32 %v1247_v28, %v4225_v2 }
 0x1b9   : > { %v1251_v31 = vpop.f32.mrf.mxu1  ;;  %1671 = vrot.lane.b32.xlu1 %v4270_v29, %s3765_s15  ;;  %5094 = vst [vmem:[#allocation33_spill] sm:$0xff] %v4333_v6  ;;  %v4341_v9 = vadd.f32 %v934_v30, %v4202_v53 }
 0x1ba   : > { %v936_v33 = vpop.f32.mrf.mxu0  ;;  %5095 = vst [vmem:[#allocation34_spill] sm:$0xff] %v4338_v7  ;;  %v4355_v16 = vadd.f32 %v1251_v31, %v4214_v59 }
 0x1bb   : > { %v1253_v34 = vpop.f32.mrf.mxu1  ;;  %2085 = vrot.lane.b32.xlu0 %v4275_v32, %s3765_s15  ;;  %5096 = vst [vmem:[#allocation35_spill] sm:$0xff] %v4341_v9  ;;  %v4352_v13 = vadd.f32 %v936_v33, %v4208_v55 }
 0x1bc   : > { %v938_v36 = vpop.f32.mrf.mxu0  ;;  %5098 = vst [vmem:[#allocation37_spill] sm:$0xff] %v4355_v16  ;;  %v4375_v25 = vadd.f32 %v1253_v34, %v4225_v2 }
 0x1bd   : > { %v1255_v37 = vpop.f32.mrf.mxu1  ;;  %1751 = vrot.lane.b32.xlu1 %v4280_v35, %s3765_s15  ;;  %5097 = vst [vmem:[#allocation36_spill] sm:$0xff] %v4352_v13  ;;  %v4370_v22 = vadd.f32 %v938_v36, %v4202_v53 }
 0x1be   : > { %v940_v39 = vpop.f32.mrf.mxu0  ;;  %5100 = vst [vmem:[#allocation39_spill] sm:$0xff] %v4375_v25  ;;  %v4384_v28 = vadd.f32 %v1255_v37, %v4214_v59 }
 0x1bf   : > { %v1257_v40 = vpop.f32.mrf.mxu1  ;;  %2007 = vrot.lane.b32.xlu0 %v4285_v38, %s3765_s15  ;;  %5099 = vst [vmem:[#allocation38_spill] sm:$0xff] %v4370_v22  ;;  %v4389_v30 = vadd.f32 %v940_v39, %v4208_v55 }
 0x1c0   : > { %v944_v43 = vpop.f32.mrf.mxu0  ;;  %5101 = vst [vmem:[#allocation40_spill] sm:$0xff] %v4384_v28  ;;  %v4398_v34 = vadd.f32 %v1257_v40, %v4225_v2 }
 0x1c1   : > { %v1261_v44 = vpop.f32.mrf.mxu1  ;;  %2087 = vrot.lane.b32.xlu1 %v4290_v41, %s3765_s15  ;;  %5102 = vst [vmem:[#allocation41_spill] sm:$0xff] %v4389_v30  ;;  %v4401_v36 = vadd.f32 %v944_v43, %v4202_v53 }
 0x1c2   : > { %v946_v45 = vpop.f32.mrf.mxu0  ;;  %5103 = vst [vmem:[#allocation42_spill] sm:$0xff] %v4398_v34 }
 0x1c3   : > { %v4299_v46 = vpop.f32.mrf.mxu1  ;;  %1673 = vrot.lane.b32.xlu0 %v4293_v42, %s3765_s15  ;;  %5104 = vst [vmem:[#allocation43_spill] sm:$0xff] %v4401_v36 }
 0x1c4   : > { %v948_v49 = vpop.f32.mrf.mxu0 }
 0x1c5   : > { %v1265_v51 = vpop.f32.mrf.mxu1  ;;  %2009 = vrot.lane.b32.xlu1 %v4302_v47, %s3765_s15 }
 0x1c6   : > { %v950_v54 = vpop.f32.mrf.mxu0 }
 0x1c7   : > { %v4311_v56 = vpop.f32.mrf.mxu1  ;;  %1753 = vrot.lane.b32.xlu0 %v4305_v48, %s3765_s15 }
 0x1c8   : > { %v954_v60 = vpop.f32.mrf.mxu0 }
 0x1c9   : > { %v4318_v61 = vpop.f32.mrf.mxu1  ;;  %1675 = vrot.lane.b32.xlu1 %v4314_v57, %s3765_s15 }
 0x1ca   : > { %v956_v3 = vpop.f32.mrf.mxu0 }
 0x1cb   : > { %2089 = vrot.lane.b32.xlu0 %v4321_v63, %s3765_s15  ;;  %v4330_v4 = vpop.f32.mrf.mxu1 }
 0x1cc   : > { %v4345_v10 = vpop.f32.mrf.mxu0 }
 0x1cd   : > { %1755 = vrot.lane.b32.xlu1 %v4326_v0, %s3765_s15  ;;  %v4347_v12 = vpop.f32.mrf.mxu1 }
 0x1ce   : > { %v4359_v17 = vpop.f32.mrf.mxu0 }
 0x1cf   : > { %2011 = vrot.lane.b32.xlu0 %v4333_v6, %s3765_s15  ;;  %v4361_v18 = vpop.f32.mrf.mxu1 }
 0x1d0   : > { %v4365_v19 = vpop.f32.mrf.mxu0 }
 0x1d1   : > { %2091 = vrot.lane.b32.xlu1 %v4338_v7, %s3765_s15  ;;  %v4367_v21 = vpop.f32.mrf.mxu1 }
 0x1d2   : > { %v4379_v26 = vpop.f32.mrf.mxu0 }
 0x1d3   : > { %1677 = vrot.lane.b32.xlu0 %v4341_v9, %s3765_s15  ;;  %v4381_v27 = vpop.f32.mrf.mxu1 }
 0x1d4   : > { %v4393_v31 = vpop.f32.mrf.mxu0 }
 0x1d5   : > { %2013 = vrot.lane.b32.xlu1 %v4352_v13, %s3765_s15  ;;  %v4395_v33 = vpop.f32.mrf.mxu1 }
 0x1d6   : > { %v4407_v37 = vpop.f32.mrf.mxu0 }
 0x1d7   : > { %1757 = vrot.lane.b32.xlu0 %v4355_v16, %s3765_s15  ;;  %v4409_v39 = vpop.f32.mrf.mxu1 }
 0x1d8   : > { %v4419_v40 = vpop.f32.mrf.mxu0 }
 0x1d9   : > { %1679 = vrot.lane.b32.xlu1 %v4370_v22, %s3765_s15  ;;  %v4421_v43 = vpop.f32.mrf.mxu1 }
 0x1db   : > { %2093 = vrot.lane.b32.xlu0 %v4375_v25, %s3765_s15  ;;  %v4415_v25 = vadd.f32 %v1261_v44, %v4214_v59  ;;  %v4432_v44 = vpop.f32.mrf.mxu1 }
 0x1dd   : > { %1759 = vrot.lane.b32.xlu1 %v4384_v28, %s3765_s15  ;;  %v4412_v28 = vadd.f32 %v946_v45, %v4208_v55  ;;  %5106 = vst [vmem:[#allocation45_spill] sm:$0xff] %v4415_v25  ;;  %v4430_v45 = vpop.f32.mrf.mxu0 }
 0x1df   : > { %2015 = vrot.lane.b32.xlu0 %v4389_v30, %s3765_s15  ;;  %5105 = vst [vmem:[#allocation44_spill] sm:$0xff] %v4412_v28  ;;  %v4441_v30 = vadd.f32 %v1265_v51, %v4214_v59  ;;  %v4459_v51 = vadd.f32 %v954_v60, %v4202_v53 }
 0x1e1   : > { %2095 = vrot.lane.b32.xlu1 %v4398_v34, %s3765_s15  ;;  %v4426_v34 = vadd.f32 %v948_v49, %v4202_v53  ;;  %5109 = vst [vmem:[#allocation48_spill] sm:$0xff] %v4441_v30  ;;  %v4445_v49 = vpop.f32.mrf.mxu0  ;;  %5112 = vst [vmem:[#allocation51_spill] sm:$0xff] %v4459_v51 }
 0x1e3   : > { %1681 = vrot.lane.b32.xlu0 %v4401_v36, %s3765_s15  ;;  %5107 = vst [vmem:[#allocation46_spill] sm:$0xff] %v4426_v34  ;;  %v4436_v36 = vadd.f32 %v4299_v46, %v4225_v2  ;;  %v4456_v46 = vadd.f32 %v4311_v56, %v4225_v2  ;;  %v4474_v56 = vadd.f32 %v4318_v61, %v4214_v59 }
 0x1e5   : > { %2017 = vrot.lane.b32.xlu1 %v4412_v28, %s3765_s15  ;;  %5108 = vst [vmem:[#allocation47_spill] sm:$0xff] %v4436_v36  ;;  %v4450_v28 = vadd.f32 %v950_v54, %v4208_v55  ;;  %5111 = vst [vmem:[#allocation50_spill] sm:$0xff] %v4456_v46 }
 0x1e6   : > { %5114 = vst [vmem:[#allocation53_spill] sm:$0xff] %v4474_v56 }
 0x1e7   : > { %1761 = vrot.lane.b32.xlu0 %v4415_v25, %s3765_s15  ;;  %v4447_v25 = vpop.f32.mrf.mxu1  ;;  %5110 = vst [vmem:[#allocation49_spill] sm:$0xff] %v4450_v28 }
 0x1e9   : > { %1683 = vrot.lane.b32.xlu1 %v4426_v34, %s3765_s15  ;;  %v4465_v34 = vpop.f32.mrf.mxu1 }
 0x1eb   : > { %2097 = vrot.lane.b32.xlu0 %v4436_v36, %s3765_s15  ;;  %v4463_v36 = vpop.f32.mrf.mxu0  ;;  %v1578_v22 = vpop.f32.mrf.mxu1 }
 0x1ed   : > { %1763 = vrot.lane.b32.xlu1 %v4441_v30, %s3765_s15  ;;  %v1538_v54 = vpop.f32.mrf.mxu0  ;;  %v4470_v30 = vadd.f32 %v956_v3, %v4208_v55  ;;  %v4485_v3 = vadd.f32 %v4345_v10, %v4202_v53 }
 0x1ef   : > { %2019 = vrot.lane.b32.xlu0 %v4450_v28, %s3765_s15  ;;  %5113 = vst [vmem:[#allocation52_spill] sm:$0xff] %v4470_v30  ;;  %v1540_v60 = vpop.f32.mrf.mxu0  ;;  %v1580_v28 = vpop.f32.mrf.mxu1  ;;  %5116 = vst [vmem:[#allocation54_spill] sm:$0xff] %v4485_v3 }
 0x1f1   : > { %2099 = vrot.lane.b32.xlu1 %v4456_v46, %s3765_s15  ;;  %v1332_v46 = vld [vmem:[%s5115_s26] sm:$0x3]  ;;  %v1542_v16 = vpop.f32.mrf.mxu0  ;;  %v1582_v13 = vpop.f32.mrf.mxu1  ;;  %s3567_s26 = scalar_lea.vmem %s4844_s3, 2048 }
 0x1f2   : > { %v4490_v61 = vrot.slane %v1332_v46, %v4194_v50  ;;  %p3568_p12 = scmp.ne.s32.totalorder %s4844_s3, %s3567_s26 }
 0x1f3   : > { %1685 = vrot.lane.b32.xlu0 %v4459_v51, %s3765_s15  ;;  %v4493_v51 = vrot.slane %v1332_v46, %v4199_v52  ;;  %v1544_v9 = vpop.f32.mrf.mxu0  ;;  %v1584_v7 = vpop.f32.mrf.mxu1 }
 0x1f4   : > { %v1539_v10 = vadd.f32 %v1538_v54, %v4490_v61  ;;  %v1579_v6 = vadd.f32 %v1578_v22, %v4490_v61  ;;  %v1543_v52 = vadd.f32 %v1542_v16, %v4490_v61  ;;  %v1583_v46 = vadd.f32 %v1582_v13, %v4490_v61  ;;  %p3569_p1 = pnand %p3568_p12, %p5146_p0 }
 0x1f5   : > { %2021 = vrot.lane.b32.xlu1 %v4470_v30, %s3765_s15  ;;  %v4497_v30 = vadd.f32 %v4330_v4, %v4225_v2  ;;  %v1581_v50 = vadd.f32 %v1580_v28, %v4493_v51  ;;  %v1545_v4 = vadd.f32 %v1544_v9, %v4493_v51  ;;  %v1585_v0 = vadd.f32 %v1584_v7, %v4493_v51  ;;  %v1548_v63 = vpop.f32.mrf.mxu0  ;;  %v1588_v57 = vpop.f32.mrf.mxu1 }
 0x1f6   : > { %v4511_v54 = vadd.f32 %v4347_v12, %v4214_v59  ;;  %v4517_v9 = vadd.f32 %v4359_v17, %v4208_v55  ;;  %v4530_v7 = vadd.f32 %v4361_v18, %v4225_v2  ;;  %v4534_v12 = vadd.f32 %v4365_v19, %v4202_v53  ;;  %p3570_p4 = pneg %p3569_p1 }
 0x1f7   : > { %1765 = vrot.lane.b32.xlu0 %v4474_v56, %s3765_s15  ;;  %v1541_v56 = vadd.f32 %v1540_v60, %v4493_v51  ;;  %v3036_v28 = vpack.c.bf16 %v1581_v50, %v1579_v6  ;;  %v3029_v60 = vpack.c.bf16 %v1545_v4, %v1543_v52  ;;  %v3037_v16 = vpack.c.bf16 %v1585_v0, %v1583_v46  ;;  %v1590_v48 = vpop.f32.mrf.mxu1 }
 0x1f8   : > { %v1549_v13 = vadd.f32 %v1548_v63, %v4490_v61  ;;  %v1589_v17 = vadd.f32 %v1588_v57, %v4490_v61  ;;  %v1591_v18 = vadd.f32 %v1590_v48, %v4493_v51  ;;  %v4554_v48 = vadd.f32 %v4367_v21, %v4214_v59 }
 0x1f9   : > { %1687 = vrot.lane.b32.xlu1 %v4485_v3, %s3765_s15  ;;  %v3028_v22 = vpack.c.bf16 %v1541_v56, %v1539_v10  ;;  %v1550_v3 = vpop.f32.mrf.mxu0  ;;  %2425 = vst [vmem:[%s4522_s7 + $0x40] sm:$0xff] %v3036_v28  ;;  %2418 = vst [vmem:[%s4522_s7 + $0x8] sm:$0xff] %v3029_v60  ;;  %v1592_v6 = vpop.f32.mrf.mxu1  ;;  %v4566_v21 = vadd.f32 %v4393_v31, %v4202_v53 }
 0x1fa   : > { %2426 = vst [vmem:[%s4522_s7 + $0x48] sm:$0xff] %v3037_v16  ;;  %v1551_v50 = vadd.f32 %v1550_v3, %v4493_v51  ;;  %v1593_v19 = vadd.f32 %v1592_v6, %v4490_v61  ;;  %v3038_v28 = vpack.c.bf16 %v1591_v18, %v1589_v17 }
 0x1fb   : > { %2101 = vrot.lane.b32.xlu0 %v4497_v30, %s3765_s15  ;;  %2417 = vst [vmem:[%s4522_s7] sm:$0xff] %v3028_v22  ;;  %v1552_v0 = vpop.f32.mrf.mxu0  ;;  %v1594_v10 = vpop.f32.mrf.mxu1  ;;  %v4550_v22 = vadd.f32 %v4379_v26, %v4208_v55 }
 0x1fc   : > { %v1553_v52 = vadd.f32 %v1552_v0, %v4490_v61  ;;  %v1595_v57 = vadd.f32 %v1594_v10, %v4493_v51  ;;  %v3030_v3 = vpack.c.bf16 %v1551_v50, %v1549_v13  ;;  %2427 = vst [vmem:[%s4522_s7 + $0x50] sm:$0xff] %v3038_v28  ;;  %v4572_v13 = vadd.f32 %v4381_v27, %v4225_v2 }
 0x1fd   : > { %1767 = vrot.lane.b32.xlu1 %v4511_v54, %s3765_s15  ;;  %v1554_v56 = vpop.f32.mrf.mxu0  ;;  %v1598_v4 = vpop.f32.mrf.mxu1 }
 0x1fe   : > { %v1555_v46 = vadd.f32 %v1554_v56, %v4493_v51  ;;  %v3039_v16 = vpack.c.bf16 %v1595_v57, %v1593_v19  ;;  %2419 = vst [vmem:[%s4522_s7 + $0x10] sm:$0xff] %v3030_v3  ;;  %v1599_v18 = vadd.f32 %v1598_v4, %v4490_v61  ;;  %v4586_v4 = vadd.f32 %v4395_v33, %v4214_v59 }
 0x1ff   : > { %2023 = vrot.lane.b32.xlu0 %v4517_v9, %s3765_s15  ;;  %v1558_v63 = vpop.f32.mrf.mxu0  ;;  %v1600_v6 = vpop.f32.mrf.mxu1 }
 0x200   : > { %v3031_v60 = vpack.c.bf16 %v1555_v46, %v1553_v52  ;;  %2428 = vst [vmem:[%s4522_s7 + $0x58] sm:$0xff] %v3039_v16  ;;  %v1559_v50 = vadd.f32 %v1558_v63, %v4490_v61  ;;  %v1601_v31 = vadd.f32 %v1600_v6, %v4493_v51 }
 0x201   : > { %2103 = vrot.lane.b32.xlu1 %v4530_v7, %s3765_s15  ;;  %v1560_v0 = vpop.f32.mrf.mxu0  ;;  %v1602_v56 = vpop.f32.mrf.mxu1 }
 0x202   : > { %2420 = vst [vmem:[%s4522_s7 + $0x18] sm:$0xff] %v3031_v60  ;;  %v1561_v52 = vadd.f32 %v1560_v0, %v4493_v51  ;;  %v1603_v46 = vadd.f32 %v1602_v56, %v4490_v61  ;;  %v3040_v60 = vpack.c.bf16 %v1601_v31, %v1599_v18  ;;  %v4592_v56 = vadd.f32 %v4407_v37, %v4208_v55 }
 0x203   : > { %1689 = vrot.lane.b32.xlu0 %v4534_v12, %s3765_s15  ;;  %v1562_v26 = vpop.f32.mrf.mxu0  ;;  %v1604_v10 = vpop.f32.mrf.mxu1 }
 0x204   : > { %v1563_v19 = vadd.f32 %v1562_v26, %v4490_v61  ;;  %v1605_v57 = vadd.f32 %v1604_v10, %v4493_v51  ;;  %v3032_v28 = vpack.c.bf16 %v1561_v52, %v1559_v50  ;;  %2429 = vst [vmem:[%s4522_s7 + $0x60] sm:$0xff] %v3040_v60  ;;  %v4602_v10 = vadd.f32 %v4409_v39, %v4225_v2 }
 0x205   : > { %2025 = vrot.lane.b32.xlu1 %v4550_v22, %s3765_s15  ;;  %v1564_v17 = vpop.f32.mrf.mxu0  ;;  %v1608_v63 = vpop.f32.mrf.mxu1  ;;  %v4606_v50 = vadd.f32 %v4419_v40, %v4202_v53 }
 0x206   : > { %v1565_v27 = vadd.f32 %v1564_v17, %v4493_v51  ;;  %v3041_v0 = vpack.c.bf16 %v1605_v57, %v1603_v46  ;;  %2421 = vst [vmem:[%s4522_s7 + $0x20] sm:$0xff] %v3032_v28  ;;  %v1609_v18 = vadd.f32 %v1608_v63, %v4490_v61  ;;  %v4623_v63 = vadd.f32 %v4430_v45, %v4208_v55 }
 0x207   : > { %1769 = vrot.lane.b32.xlu0 %v4554_v48, %s3765_s15  ;;  %v1568_v3 = vpop.f32.mrf.mxu0  ;;  %v1610_v26 = vpop.f32.mrf.mxu1  ;;  %v4627_v28 = vadd.f32 %v4421_v43, %v4214_v59 }
 0x208   : > { %v3033_v16 = vpack.c.bf16 %v1565_v27, %v1563_v19  ;;  %2430 = vst [vmem:[%s4522_s7 + $0x68] sm:$0xff] %v3041_v0  ;;  %v1569_v37 = vadd.f32 %v1568_v3, %v4490_v61  ;;  %v1611_v19 = vadd.f32 %v1610_v26, %v4493_v51  ;;  %v1617_v3 = vld [vmem:[%s4117_s2] sm:$0xff]  ;;  %v4644_v26 = vadd.f32 %v4445_v49, %v4202_v53 }
 0x209   : > { %1691 = vrot.lane.b32.xlu1 %v4566_v21, %s3765_s15  ;;  %v1570_v6 = vpop.f32.mrf.mxu0  ;;  %v1612_v17 = vpop.f32.mrf.mxu1  ;;  %v1649_v43 = vmul.f32 %v1617_v3, %v4211_v58  ;;  %v1729_v53 = vmul.f32 %v1617_v3, %v4222_v1  ;;  %v2065_v1 = vmul.f32 %v1617_v3, %v4235_v8  ;;  %v4678_v8 = vadd.f32 %v4465_v34, %v4225_v2  ;;  %v1635_v34 = vld [vmem:[%s4632_s10 + $0x10] sm:$0xff] }
 0x20a   : > { %2422 = vst [vmem:[%s4522_s7 + $0x28] sm:$0xff] %v3033_v16  ;;  %v1571_v39 = vadd.f32 %v1570_v6, %v4493_v51  ;;  %v1613_v46 = vadd.f32 %v1612_v17, %v4490_v61  ;;  %v1985_v17 = vmul.f32 %v1617_v3, %v4217_v62 }
 0x20b   : > { %2105 = vrot.lane.b32.xlu0 %v4572_v13, %s3765_s15  ;;  %v1572_v33 = vpop.f32.mrf.mxu0  ;;  %v1614_v31 = vpop.f32.mrf.mxu1 }
 0x20c   : > { %v1573_v40 = vadd.f32 %v1572_v33, %v4490_v61  ;;  %v1615_v57 = vadd.f32 %v1614_v31, %v4493_v51  ;;  %v1633_v61 = vld [vmem:[%s4632_s10] sm:$0xff]  ;;  %v3034_v60 = vpack.c.bf16 %v1571_v39, %v1569_v37  ;;  %v1618_v37 = vld [vmem:[%s4117_s2 + $0x8] sm:$0xff]  ;;  %v4652_v31 = vadd.f32 %v4463_v36, %v4208_v55 }
 0x20d   : > { %1771 = vrot.lane.b32.xlu1 %v4586_v4, %s3765_s15  ;;  %v1574_v52 = vpop.f32.mrf.mxu0  ;;  %v1634_v39 = vld [vmem:[%s4632_s10 + $0x8] sm:$0xff]  ;;  %v1730_v62 = vmul.f32 %v1618_v37, %v4230_v5  ;;  %v2066_v3 = vmul.f32 %v1618_v37, %v4240_v11 }
 0x20e   : > { %v1575_v27 = vadd.f32 %v1574_v52, %v4493_v51  ;;  %v3042_v51 = vpack.c.bf16 %v1611_v19, %v1609_v18  ;;  %v3043_v0 = vpack.c.bf16 %v1615_v57, %v1613_v46  ;;  %2423 = vst [vmem:[%s4522_s7 + $0x30] sm:$0xff] %v3034_v60  ;;  %v4661_v46 = vadd.f32 %v4447_v25, %v4214_v59 }
 0x20f   : > { %2027 = vrot.lane.b32.xlu0 %v4592_v56, %s3765_s15 }
 0x210   : > { %v3035_v16 = vpack.c.bf16 %v1575_v27, %v1573_v40  ;;  %2431 = vst [vmem:[%s4522_s7 + $0x70] sm:$0xff] %v3042_v51  ;;  %2432 = vst [vmem:[%s4522_s7 + $0x78] sm:$0xff] %v3043_v0  ;;  %v4668_v51 = vadd.f32 %v4432_v44, %v4225_v2 }
 0x211   : > { %2107 = vrot.lane.b32.xlu1 %v4602_v10, %s3765_s15 }
 0x212   : > { %2424 = vst [vmem:[%s4522_s7 + $0x38] sm:$0xff] %v3035_v16 }
 0x213   : > { %1693 = vrot.lane.b32.xlu0 %v4606_v50, %s3765_s15 }
 0x215   : > { %2029 = vrot.lane.b32.xlu1 %v4623_v63, %s3765_s15  ;;  %v1666_v45 = vpop.permute.xlu0 %1665 }
 0x216   : > { %v1697_v6 = vmul.f32 %v1666_v45, %v1633_v61 }
 0x217   : > { %v2002_v33 = vpop.permute.xlu1 %2001  ;;  %1773 = vrot.lane.b32.xlu0 %v4627_v28, %s3765_s15 }
 0x218   : > { %v1713_v18 = vadd.f32 %v1697_v6, %v1649_v43  ;;  %v2033_v52 = vmul.f32 %v2002_v33, %v1633_v61  ;;  %v1619_v6 = vld [vmem:[%s4117_s2 + $0x10] sm:$0xff]  ;;  %v1650_v33 = vmul.f32 %v1618_v37, %v4245_v14 }
 0x219   : > { %1695 = vrot.lane.b32.xlu1 %v4644_v26, %s3765_s15  ;;  %v1746_v58 = vpop.permute.xlu0 %1745 }
 0x21a   : > { %v1809_v49 = vmul.f32 0.088388346, %v1713_v18  ;;  %v2049_v19 = vadd.f32 %v2033_v52, %v1985_v17  ;;  %v1777_v40 = vmul.f32 %v1746_v58, %v1633_v61  ;;  %v1651_v58 = vmul.f32 %v1619_v6, %v4248_v15 }
 0x21b   : > { %v1748_v27 = vpop.permute.xlu1 %1747  ;;  %2031 = vrot.lane.b32.xlu0 %v4652_v31, %s3765_s15 }
 0x21c   : > { %v2964_v55 = vpack.c.bf16 %v1809_v49, %v1809_v49  ;;  %v2145_v36 = vmul.f32 0.088388346, %v2049_v19  ;;  %v1793_v57 = vadd.f32 %v1777_v40, %v1729_v53  ;;  %v1778_v60 = vmul.f32 %v1748_v27, %v1634_v39 }
 0x21d   : > { %1775 = vrot.lane.b32.xlu1 %v4661_v46, %s3765_s15  ;;  %v2082_v59 = vpop.permute.xlu0 %2081 }
 0x21e   : > { %1889 = vst [vmem:[%s4673_s9] sm:$0xf] %v2964_v55  ;;  %v2996_v5 = vpack.c.bf16 %v2145_v36, %v2145_v36  ;;  %v2980_v25 = vpack.c.bf16 %v1793_v57, %v1793_v57  ;;  %v1794_v16 = vadd.f32 %v1778_v60, %v1730_v62  ;;  %v2113_v0 = vmul.f32 %v2082_v59, %v1633_v61  ;;  %v1620_v60 = vld [vmem:[%s4117_s2 + $0x18] sm:$0xff] }
 0x21f   : > { %v2084_v44 = vpop.permute.xlu1 %2083  ;;  %2109 = vrot.lane.b32.xlu0 %v4668_v51, %s3765_s15  ;;  %v1986_v62 = vmul.f32 %v1618_v37, %v4255_v20  ;;  %v1987_v36 = vmul.f32 %v1619_v6, %v4260_v23 }
 0x220   : > { %2225 = vst [vmem:[%s4673_s9 + $0x4] sm:$0xf] %v2996_v5  ;;  %1969 = vst [vmem:[%s4685_s12] sm:$0xf] %v2980_v25  ;;  %v2981_v45 = vpack.c.bf16 %v1794_v16, %v1794_v16  ;;  %v2129_v43 = vadd.f32 %v2113_v0, %v2065_v1  ;;  %v2114_v61 = vmul.f32 %v2084_v44, %v1634_v39  ;;  %v1636_v0 = vld [vmem:[%s4632_s10 + $0x18] sm:$0xff] }
 0x221   : > { %2111 = vrot.lane.b32.xlu1 %v4678_v8, %s3765_s15  ;;  %v1668_v2 = vpop.permute.xlu0 %1667  ;;  %v1731_v25 = vmul.f32 %v1619_v6, %v4263_v24  ;;  %v2067_v24 = vmul.f32 %v1619_v6, %v4275_v32  ;;  %v1988_v32 = vmul.f32 %v1620_v60, %v4285_v38  ;;  %s2479_s15 = sshll.u32 %s4685_s12, 4  ;;  %s4887_s15 = int_to_ptr.vmem [resolvable:$true] %s2479_s15 }
 0x222   : > { %1970 = vst [vmem:[%s4685_s12 + $0x8] sm:$0xf] %v2981_v45  ;;  %v3012_v11 = vpack.c.bf16 %v2129_v43, %v2129_v43  ;;  %v2130_v17 = vadd.f32 %v2114_v61, %v2066_v3  ;;  %v1698_v18 = vmul.f32 %v1668_v2, %v1634_v39 }
 0x223   : > { %v1670_v52 = vpop.permute.xlu1 %1669 }
 0x224   : > { %2305 = vst [vmem:[%s4685_s12 + $0x4] sm:$0xf] %v3012_v11  ;;  %v3013_v53 = vpack.c.bf16 %v2130_v17, %v2130_v17  ;;  %v1714_v49 = vadd.f32 %v1698_v18, %v1650_v33  ;;  %v1699_v19 = vmul.f32 %v1670_v52, %v1635_v34 }
 0x225   : > { %v2004_v40 = vpop.permute.xlu0 %2003 }
 0x226   : > { %2306 = vst [vmem:[%s4685_s12 + $0xc] sm:$0xf] %v3013_v53  ;;  %v1810_v27 = vmul.f32 0.088388346, %v1714_v49  ;;  %v1715_v14 = vadd.f32 %v1699_v19, %v1651_v58  ;;  %v2034_v55 = vmul.f32 %v2004_v40, %v1634_v39  ;;  %v1652_v39 = vmul.f32 %v1620_v60, %v4270_v29 }
 0x227   : > { %v2006_v57 = vpop.permute.xlu1 %2005  ;;  %v1732_v29 = vmul.f32 %v1620_v60, %v4280_v35  ;;  %v2068_v35 = vmul.f32 %v1620_v60, %v4290_v41 }
 0x228   : > { %v2965_v1 = vpack.c.bf16 %v1810_v27, %v1810_v27  ;;  %v1811_v15 = vmul.f32 0.088388346, %v1715_v14  ;;  %v2050_v59 = vadd.f32 %v2034_v55, %v1986_v62  ;;  %v2035_v5 = vmul.f32 %v2006_v57, %v1635_v34 }
 0x229   : > { %v1750_v16 = vpop.permute.xlu0 %1749 }
 0x22a   : > { %1890 = vst [vmem:[%s4673_s9 + $0x8] sm:$0xf] %v2965_v1  ;;  %v2966_v20 = vpack.c.bf16 %v1811_v15, %v1811_v15  ;;  %v2146_v37 = vmul.f32 0.088388346, %v2050_v59  ;;  %v2051_v44 = vadd.f32 %v2035_v5, %v1987_v36  ;;  %v1779_v3 = vmul.f32 %v1750_v16, %v1635_v34  ;;  %v1637_v36 = vld [vmem:[%s4632_s10 + $0x20] sm:$0xff] }
 0x22b   : > { %v1672_v23 = vpop.permute.xlu1 %1671 }
 0x22c   : > { %1891 = vst [vmem:[%s4673_s9 + $0x10] sm:$0xf] %v2966_v20  ;;  %v2997_v45 = vpack.c.bf16 %v2146_v37, %v2146_v37  ;;  %v2147_v43 = vmul.f32 0.088388346, %v2051_v44  ;;  %v1795_v61 = vadd.f32 %v1779_v3, %v1731_v25  ;;  %v1700_v2 = vmul.f32 %v1672_v23, %v1636_v0  ;;  %v1622_v44 = vld [vmem:[%s4117_s2 + $0x28] sm:$0xff] }
 0x22d   : > { %v2086_v33 = vpop.permute.xlu0 %2085 }
 0x22e   : > { %2226 = vst [vmem:[%s4673_s9 + $0xc] sm:$0xf] %v2997_v45  ;;  %v2998_v11 = vpack.c.bf16 %v2147_v43, %v2147_v43  ;;  %v2982_v17 = vpack.c.bf16 %v1795_v61, %v1795_v61  ;;  %v1716_v18 = vadd.f32 %v1700_v2, %v1652_v39  ;;  %v2115_v52 = vmul.f32 %v2086_v33, %v1635_v34  ;;  %v1621_v34 = vld [vmem:[%s4117_s2 + $0x20] sm:$0xff] }
 0x22f   : > { %v1752_v58 = vpop.permute.xlu1 %1751  ;;  %v1653_v38 = vmul.f32 %v1621_v34, %v4293_v42  ;;  %v1989_v20 = vmul.f32 %v1621_v34, %v4302_v47  ;;  %v5117_v45 = vld [vmem:[#allocation29_spill] sm:$0xff] }
 0x230   : > { %2227 = vst [vmem:[%s4673_s9 + $0x14] sm:$0xf] %v2998_v11  ;;  %1971 = vst [vmem:[%s4685_s12 + $0x10] sm:$0xf] %v2982_v17  ;;  %v1812_v53 = vmul.f32 0.088388346, %v1716_v18  ;;  %v2131_v49 = vadd.f32 %v2115_v52, %v2067_v24  ;;  %v1780_v19 = vmul.f32 %v1752_v58, %v1636_v0  ;;  %v1733_v43 = vmul.f32 %v1621_v34, %v5117_v45 }
 0x231   : > { %v2008_v6 = vpop.permute.xlu0 %2007  ;;  %v5118_v24 = vld [vmem:[#allocation30_spill] sm:$0xff]  ;;  %v5119_v58 = vld [vmem:[#allocation31_spill] sm:$0xff] }
 0x232   : > { %v2967_v40 = vpack.c.bf16 %v1812_v53, %v1812_v53  ;;  %v3014_v62 = vpack.c.bf16 %v2131_v49, %v2131_v49  ;;  %v1796_v27 = vadd.f32 %v1780_v19, %v1732_v29  ;;  %v2036_v14 = vmul.f32 %v2008_v6, %v1636_v0 }
 0x233   : > { %v2088_v55 = vpop.permute.xlu1 %2087  ;;  %v1654_v33 = vmul.f32 %v1622_v44, %v5118_v24  ;;  %v2069_v29 = vmul.f32 %v1621_v34, %v5119_v58  ;;  %v5125_v58 = vld [vmem:[#allocation37_spill] sm:$0xff] }
 0x234   : > { %1892 = vst [vmem:[%s4673_s9 + $0x18] sm:$0xf] %v2967_v40  ;;  %2307 = vst [vmem:[%s4685_s12 + $0x14] sm:$0xf] %v3014_v62  ;;  %v2983_v57 = vpack.c.bf16 %v1796_v27, %v1796_v27  ;;  %v2052_v1 = vadd.f32 %v2036_v14, %v1988_v32  ;;  %v2116_v15 = vmul.f32 %v2088_v55, %v1636_v0  ;;  %v1638_v0 = vld [vmem:[%s4632_s10 + $0x28] sm:$0xff]  ;;  %v5120_v62 = vld [vmem:[#allocation32_spill] sm:$0xff] }
 0x235   : > { %v1674_v59 = vpop.permute.xlu0 %1673  ;;  %v1734_v27 = vmul.f32 %v1622_v44, %v5120_v62 }
 0x236   : > { %1972 = vst [vmem:[%s4685_s12 + $0x18] sm:$0xf] %v2983_v57  ;;  %v2148_v5 = vmul.f32 0.088388346, %v2052_v1  ;;  %v2132_v25 = vadd.f32 %v2116_v15, %v2068_v35  ;;  %v1701_v16 = vmul.f32 %v1674_v59, %v1637_v36  ;;  %v5121_v57 = vld [vmem:[#allocation33_spill] sm:$0xff] }
 0x237   : > { %v2010_v37 = vpop.permute.xlu1 %2009  ;;  %v1990_v34 = vmul.f32 %v1622_v44, %v5121_v57 }
 0x238   : > { %v2999_v41 = vpack.c.bf16 %v2148_v5, %v2148_v5  ;;  %v3015_v60 = vpack.c.bf16 %v2132_v25, %v2132_v25  ;;  %v1717_v3 = vadd.f32 %v1701_v16, %v1653_v38  ;;  %v2037_v39 = vmul.f32 %v2010_v37, %v1637_v36  ;;  %v1639_v16 = vld [vmem:[%s4632_s10 + $0x30] sm:$0xff] }
 0x239   : > { %v1754_v23 = vpop.permute.xlu0 %1753 }
 0x23a   : > { %2228 = vst [vmem:[%s4673_s9 + $0x1c] sm:$0xf] %v2999_v41  ;;  %2308 = vst [vmem:[%s4685_s12 + $0x1c] sm:$0xf] %v3015_v60  ;;  %v1813_v42 = vmul.f32 0.088388346, %v1717_v3  ;;  %v2053_v61 = vadd.f32 %v2037_v39, %v1989_v20  ;;  %v1781_v2 = vmul.f32 %v1754_v23, %v1637_v36 }
 0x23b   : > { %v1676_v47 = vpop.permute.xlu1 %1675  ;;  %v5122_v20 = vld [vmem:[#allocation34_spill] sm:$0xff]  ;;  %v5123_v23 = vld [vmem:[#allocation35_spill] sm:$0xff] }
 0x23c   : > { %v2968_v11 = vpack.c.bf16 %v1813_v42, %v1813_v42  ;;  %v2149_v17 = vmul.f32 0.088388346, %v2053_v61  ;;  %v1797_v18 = vadd.f32 %v1781_v2, %v1733_v43  ;;  %v1702_v52 = vmul.f32 %v1676_v47, %v1638_v0  ;;  %v5124_v2 = vld [vmem:[#allocation36_spill] sm:$0xff] }
 0x23d   : > { %v2090_v53 = vpop.permute.xlu0 %2089  ;;  %v2070_v37 = vmul.f32 %v1622_v44, %v5122_v20  ;;  %v1624_v47 = vld [vmem:[%s4117_s2 + $0x38] sm:$0xff] }
 0x23e   : > { %1893 = vst [vmem:[%s4673_s9 + $0x20] sm:$0xf] %v2968_v11  ;;  %v3000_v49 = vpack.c.bf16 %v2149_v17, %v2149_v17  ;;  %v2984_v19 = vpack.c.bf16 %v1797_v18, %v1797_v18  ;;  %v1718_v32 = vadd.f32 %v1702_v52, %v1654_v33  ;;  %v2117_v6 = vmul.f32 %v2090_v53, %v1637_v36  ;;  %v1623_v36 = vld [vmem:[%s4117_s2 + $0x30] sm:$0xff] }
 0x23f   : > { %v1756_v40 = vpop.permute.xlu1 %1755  ;;  %v1655_v45 = vmul.f32 %v1623_v36, %v5123_v23  ;;  %v1991_v24 = vmul.f32 %v1623_v36, %v5124_v2  ;;  %v1641_v2 = vld [vmem:[%s4632_s10 + $0x40] sm:$0xff] }
 0x240   : > { %2229 = vst [vmem:[%s4673_s9 + $0x24] sm:$0xf] %v3000_v49  ;;  %1973 = vst [vmem:[%s4685_s12 + $0x20] sm:$0xf] %v2984_v19  ;;  %v1814_v14 = vmul.f32 0.088388346, %v1718_v32  ;;  %v2133_v55 = vadd.f32 %v2117_v6, %v2069_v29  ;;  %v1782_v35 = vmul.f32 %v1756_v40, %v1638_v0  ;;  %v1735_v29 = vmul.f32 %v1623_v36, %v5125_v58 }
 0x241   : > { %v2012_v1 = vpop.permute.xlu0 %2011  ;;  %v5126_v32 = vld [vmem:[#allocation38_spill] sm:$0xff] }
 0x242   : > { %v2969_v15 = vpack.c.bf16 %v1814_v14, %v1814_v14  ;;  %v3016_v59 = vpack.c.bf16 %v2133_v55, %v2133_v55  ;;  %v1798_v38 = vadd.f32 %v1782_v35, %v1734_v27  ;;  %v2038_v5 = vmul.f32 %v2012_v1, %v1638_v0  ;;  %v5127_v35 = vld [vmem:[#allocation39_spill] sm:$0xff] }
 0x243   : > { %v2092_v25 = vpop.permute.xlu1 %2091  ;;  %v1656_v6 = vmul.f32 %v1624_v47, %v5126_v32  ;;  %v2071_v57 = vmul.f32 %v1623_v36, %v5127_v35  ;;  %v5133_v35 = vld [vmem:[#allocation45_spill] sm:$0xff] }
 0x244   : > { %1894 = vst [vmem:[%s4673_s9 + $0x28] sm:$0xf] %v2969_v15  ;;  %2309 = vst [vmem:[%s4685_s12 + $0x24] sm:$0xf] %v3016_v59  ;;  %v2985_v41 = vpack.c.bf16 %v1798_v38, %v1798_v38  ;;  %v2054_v60 = vadd.f32 %v2038_v5, %v1990_v34  ;;  %v2118_v3 = vmul.f32 %v2092_v25, %v1638_v0  ;;  %v1640_v0 = vld [vmem:[%s4632_s10 + $0x38] sm:$0xff] }
 0x245   : > { %v1678_v39 = vpop.permute.xlu0 %1677  ;;  %v5128_v25 = vld [vmem:[#allocation40_spill] sm:$0xff] }
 0x246   : > { %1974 = vst [vmem:[%s4685_s12 + $0x28] sm:$0xf] %v2985_v41  ;;  %v2150_v43 = vmul.f32 0.088388346, %v2054_v60  ;;  %v2134_v42 = vadd.f32 %v2118_v3, %v2070_v37  ;;  %v1703_v61 = vmul.f32 %v1678_v39, %v1639_v16  ;;  %v1736_v20 = vmul.f32 %v1624_v47, %v5128_v25  ;;  %v5129_v3 = vld [vmem:[#allocation41_spill] sm:$0xff] }
 0x247   : > { %v2014_v33 = vpop.permute.xlu1 %2013  ;;  %v1992_v36 = vmul.f32 %v1624_v47, %v5129_v3 }
 0x248   : > { %v3001_v44 = vpack.c.bf16 %v2150_v43, %v2150_v43  ;;  %v3017_v11 = vpack.c.bf16 %v2134_v42, %v2134_v42  ;;  %v1719_v17 = vadd.f32 %v1703_v61, %v1655_v45  ;;  %v2039_v18 = vmul.f32 %v2014_v33, %v1639_v16 }
 0x249   : > { %v1758_v52 = vpop.permute.xlu0 %1757 }
 0x24a   : > { %2230 = vst [vmem:[%s4673_s9 + $0x2c] sm:$0xf] %v3001_v44  ;;  %2310 = vst [vmem:[%s4685_s12 + $0x2c] sm:$0xf] %v3017_v11  ;;  %v1815_v53 = vmul.f32 0.088388346, %v1719_v17  ;;  %v2055_v49 = vadd.f32 %v2039_v18, %v1991_v24  ;;  %v1783_v19 = vmul.f32 %v1758_v52, %v1639_v16 }
 0x24b   : > { %v1680_v40 = vpop.permute.xlu1 %1679  ;;  %v5130_v24 = vld [vmem:[#allocation42_spill] sm:$0xff]  ;;  %v5131_v52 = vld [vmem:[#allocation43_spill] sm:$0xff] }
 0x24c   : > { %v2970_v62 = vpack.c.bf16 %v1815_v53, %v1815_v53  ;;  %v2151_v27 = vmul.f32 0.088388346, %v2055_v49  ;;  %v1799_v14 = vadd.f32 %v1783_v19, %v1735_v29  ;;  %v1704_v55 = vmul.f32 %v1680_v40, %v1640_v0  ;;  %v5132_v19 = vld [vmem:[#allocation44_spill] sm:$0xff]  ;;  %v1626_v40 = vld [vmem:[%s4117_s2 + $0x48] sm:$0xff] }
 0x24d   : > { %v2094_v34 = vpop.permute.xlu0 %2093  ;;  %v2072_v33 = vmul.f32 %v1624_v47, %v5130_v24 }
 0x24e   : > { %1895 = vst [vmem:[%s4673_s9 + $0x30] sm:$0xf] %v2970_v62  ;;  %v3002_v1 = vpack.c.bf16 %v2151_v27, %v2151_v27  ;;  %v2986_v15 = vpack.c.bf16 %v1799_v14, %v1799_v14  ;;  %v1720_v59 = vadd.f32 %v1704_v55, %v1656_v6  ;;  %v2119_v38 = vmul.f32 %v2094_v34, %v1639_v16  ;;  %v1625_v16 = vld [vmem:[%s4117_s2 + $0x40] sm:$0xff] }
 0x24f   : > { %v1760_v5 = vpop.permute.xlu1 %1759  ;;  %v1657_v58 = vmul.f32 %v1625_v16, %v5131_v52  ;;  %v1993_v32 = vmul.f32 %v1625_v16, %v5132_v19  ;;  %v1643_v19 = vld [vmem:[%s4632_s10 + $0x50] sm:$0xff] }
 0x250   : > { %2231 = vst [vmem:[%s4673_s9 + $0x34] sm:$0xf] %v3002_v1  ;;  %1975 = vst [vmem:[%s4685_s12 + $0x30] sm:$0xf] %v2986_v15  ;;  %v1816_v37 = vmul.f32 0.088388346, %v1720_v59  ;;  %v2135_v41 = vadd.f32 %v2119_v38, %v2071_v57  ;;  %v1784_v60 = vmul.f32 %v1760_v5, %v1640_v0  ;;  %v1737_v57 = vmul.f32 %v1625_v16, %v5133_v35 }
 0x251   : > { %v2016_v39 = vpop.permute.xlu0 %2015  ;;  %v5134_v59 = vld [vmem:[#allocation46_spill] sm:$0xff] }
 0x252   : > { %v2971_v23 = vpack.c.bf16 %v1816_v37, %v1816_v37  ;;  %v3018_v45 = vpack.c.bf16 %v2135_v41, %v2135_v41  ;;  %v1800_v43 = vadd.f32 %v1784_v60, %v1736_v20  ;;  %v2040_v42 = vmul.f32 %v2016_v39, %v1640_v0  ;;  %v5135_v60 = vld [vmem:[#allocation47_spill] sm:$0xff] }
 0x253   : > { %v2096_v61 = vpop.permute.xlu1 %2095  ;;  %v1658_v38 = vmul.f32 %v1626_v40, %v5134_v59  ;;  %v2073_v3 = vmul.f32 %v1625_v16, %v5135_v60  ;;  %v5141_v60 = vld [vmem:[#allocation53_spill] sm:$0xff] }
 0x254   : > { %1896 = vst [vmem:[%s4673_s9 + $0x38] sm:$0xf] %v2971_v23  ;;  %2311 = vst [vmem:[%s4685_s12 + $0x34] sm:$0xf] %v3018_v45  ;;  %v2987_v44 = vpack.c.bf16 %v1800_v43, %v1800_v43  ;;  %v2056_v11 = vadd.f32 %v2040_v42, %v1992_v36  ;;  %v2120_v17 = vmul.f32 %v2096_v61, %v1640_v0  ;;  %v1642_v0 = vld [vmem:[%s4632_s10 + $0x48] sm:$0xff]  ;;  %v5136_v61 = vld [vmem:[#allocation48_spill] sm:$0xff] }
 0x255   : > { %v1682_v18 = vpop.permute.xlu0 %1681  ;;  %v1738_v24 = vmul.f32 %v1626_v40, %v5136_v61 }
 0x256   : > { %1976 = vst [vmem:[%s4685_s12 + $0x38] sm:$0xf] %v2987_v44  ;;  %v2152_v29 = vmul.f32 0.088388346, %v2056_v11  ;;  %v2136_v53 = vadd.f32 %v2120_v17, %v2072_v33  ;;  %v1705_v49 = vmul.f32 %v1682_v18, %v1641_v2  ;;  %v5137_v17 = vld [vmem:[#allocation49_spill] sm:$0xff] }
 0x257   : > { %v2018_v6 = vpop.permute.xlu1 %2017  ;;  %v1994_v16 = vmul.f32 %v1626_v40, %v5137_v17 }
 0x258   : > { %v3003_v47 = vpack.c.bf16 %v2152_v29, %v2152_v29  ;;  %v3019_v62 = vpack.c.bf16 %v2136_v53, %v2136_v53  ;;  %v1721_v27 = vadd.f32 %v1705_v49, %v1657_v58  ;;  %v2041_v14 = vmul.f32 %v2018_v6, %v1641_v2 }
 0x259   : > { %v1762_v55 = vpop.permute.xlu0 %1761 }
 0x25a   : > { %2232 = vst [vmem:[%s4673_s9 + $0x3c] sm:$0xf] %v3003_v47  ;;  %2312 = vst [vmem:[%s4685_s12 + $0x3c] sm:$0xf] %v3019_v62  ;;  %v1817_v34 = vmul.f32 0.088388346, %v1721_v27  ;;  %v2057_v1 = vadd.f32 %v2041_v14, %v1993_v32  ;;  %v1785_v15 = vmul.f32 %v1762_v55, %v1641_v2 }
 0x25b   : > { %v1684_v5 = vpop.permute.xlu1 %1683  ;;  %v5138_v32 = vld [vmem:[#allocation50_spill] sm:$0xff]  ;;  %v5139_v55 = vld [vmem:[#allocation51_spill] sm:$0xff] }
 0x25c   : > { %v2972_v25 = vpack.c.bf16 %v1817_v34, %v1817_v34  ;;  %v2153_v20 = vmul.f32 0.088388346, %v2057_v1  ;;  %v1801_v37 = vadd.f32 %v1785_v15, %v1737_v57  ;;  %v1706_v41 = vmul.f32 %v1684_v5, %v1642_v0  ;;  %v5140_v15 = vld [vmem:[#allocation52_spill] sm:$0xff] }
 0x25d   : > { %v2098_v36 = vpop.permute.xlu0 %2097  ;;  %v2074_v6 = vmul.f32 %v1626_v40, %v5138_v32  ;;  %v1628_v5 = vld [vmem:[%s4117_s2 + $0x58] sm:$0xff] }
 0x25e   : > { %1897 = vst [vmem:[%s4673_s9 + $0x40] sm:$0xf] %v2972_v25  ;;  %v3004_v39 = vpack.c.bf16 %v2153_v20, %v2153_v20  ;;  %v2988_v23 = vpack.c.bf16 %v1801_v37, %v1801_v37  ;;  %v1722_v45 = vadd.f32 %v1706_v41, %v1658_v38  ;;  %v2121_v43 = vmul.f32 %v2098_v36, %v1641_v2  ;;  %v1627_v2 = vld [vmem:[%s4117_s2 + $0x50] sm:$0xff] }
 0x25f   : > { %v1764_v42 = vpop.permute.xlu1 %1763  ;;  %v1659_v35 = vmul.f32 %v1627_v2, %v5139_v55  ;;  %v1995_v59 = vmul.f32 %v1627_v2, %v5140_v15 }
 0x260   : > { %2233 = vst [vmem:[%s4673_s9 + $0x44] sm:$0xf] %v3004_v39  ;;  %1977 = vst [vmem:[%s4685_s12 + $0x40] sm:$0xf] %v2988_v23  ;;  %v1818_v33 = vmul.f32 0.088388346, %v1722_v45  ;;  %v2137_v44 = vadd.f32 %v2121_v43, %v2073_v3  ;;  %v1786_v11 = vmul.f32 %v1764_v42, %v1642_v0  ;;  %v1739_v3 = vmul.f32 %v1627_v2, %v5141_v60 }
 0x261   : > { %v2020_v18 = vpop.permute.xlu0 %2019  ;;  %v5142_v45 = vld [vmem:[#allocation54_spill] sm:$0xff] }
 0x262   : > { %v2973_v52 = vpack.c.bf16 %v1818_v33, %v1818_v33  ;;  %v3020_v58 = vpack.c.bf16 %v2137_v44, %v2137_v44  ;;  %v1802_v29 = vadd.f32 %v1786_v11, %v1738_v24  ;;  %v2042_v53 = vmul.f32 %v2020_v18, %v1642_v0 }
 0x263   : > { %v2100_v49 = vpop.permute.xlu1 %2099  ;;  %v1660_v43 = vmul.f32 %v1628_v5, %v5142_v45  ;;  %v2075_v11 = vmul.f32 %v1627_v2, %v4497_v30  ;;  %v1996_v30 = vmul.f32 %v1628_v5, %v4517_v9 }
 0x264   : > { %1898 = vst [vmem:[%s4673_s9 + $0x48] sm:$0xf] %v2973_v52  ;;  %2313 = vst [vmem:[%s4685_s12 + $0x44] sm:$0xf] %v3020_v58  ;;  %v2989_v47 = vpack.c.bf16 %v1802_v29, %v1802_v29  ;;  %v2058_v62 = vadd.f32 %v2042_v53, %v1994_v16  ;;  %v2122_v27 = vmul.f32 %v2100_v49, %v1642_v0  ;;  %v1644_v0 = vld [vmem:[%s4632_s10 + $0x58] sm:$0xff] }
 0x265   : > { %v1686_v14 = vpop.permute.xlu0 %1685  ;;  %v1740_v53 = vmul.f32 %v1628_v5, %v4511_v54  ;;  %v2076_v54 = vmul.f32 %v1628_v5, %v4530_v7 }
 0x266   : > { %1978 = vst [vmem:[%s4685_s12 + $0x48] sm:$0xf] %v2989_v47  ;;  %v2154_v57 = vmul.f32 0.088388346, %v2058_v62  ;;  %v2138_v34 = vadd.f32 %v2122_v27, %v2074_v6  ;;  %v1707_v1 = vmul.f32 %v1686_v14, %v1643_v19 }
 0x267   : > { %v2022_v38 = vpop.permute.xlu1 %2021 }
 0x268   : > { %v3005_v40 = vpack.c.bf16 %v2154_v57, %v2154_v57  ;;  %v3021_v25 = vpack.c.bf16 %v2138_v34, %v2138_v34  ;;  %v1723_v20 = vadd.f32 %v1707_v1, %v1659_v35  ;;  %v2043_v37 = vmul.f32 %v2022_v38, %v1643_v19  ;;  %v1645_v35 = vld [vmem:[%s4632_s10 + $0x60] sm:$0xff] }
 0x269   : > { %v1766_v41 = vpop.permute.xlu0 %1765 }
 0x26a   : > { %2234 = vst [vmem:[%s4673_s9 + $0x4c] sm:$0xf] %v3005_v40  ;;  %2314 = vst [vmem:[%s4685_s12 + $0x4c] sm:$0xf] %v3021_v25  ;;  %v1819_v36 = vmul.f32 0.088388346, %v1723_v20  ;;  %v2059_v39 = vadd.f32 %v2043_v37, %v1995_v59  ;;  %v1787_v23 = vmul.f32 %v1766_v41, %v1643_v19 }
 0x26b   : > { %v1688_v42 = vpop.permute.xlu1 %1687  ;;  %v1630_v37 = vld [vmem:[%s4117_s2 + $0x68] sm:$0xff] }
 0x26c   : > { %v2974_v61 = vpack.c.bf16 %v1819_v36, %v1819_v36  ;;  %v2155_v24 = vmul.f32 0.088388346, %v2059_v39  ;;  %v1803_v33 = vadd.f32 %v1787_v23, %v1739_v3  ;;  %v1708_v44 = vmul.f32 %v1688_v42, %v1644_v0 }
 0x26d   : > { %v2102_v17 = vpop.permute.xlu0 %2101  ;;  %v1662_v45 = vmul.f32 %v1630_v37, %v4566_v21 }
 0x26e   : > { %1899 = vst [vmem:[%s4673_s9 + $0x50] sm:$0xf] %v2974_v61  ;;  %v3006_v16 = vpack.c.bf16 %v2155_v24, %v2155_v24  ;;  %v2990_v18 = vpack.c.bf16 %v1803_v33, %v1803_v33  ;;  %v1724_v52 = vadd.f32 %v1708_v44, %v1660_v43  ;;  %v2123_v58 = vmul.f32 %v2102_v17, %v1643_v19  ;;  %v1629_v19 = vld [vmem:[%s4117_s2 + $0x60] sm:$0xff] }
 0x26f   : > { %v1768_v29 = vpop.permute.xlu1 %1767  ;;  %v1661_v9 = vmul.f32 %v1629_v19, %v4534_v12  ;;  %v1997_v25 = vmul.f32 %v1629_v19, %v4550_v22  ;;  %v1741_v36 = vmul.f32 %v1629_v19, %v4554_v48  ;;  %v2077_v33 = vmul.f32 %v1629_v19, %v4572_v13 }
 0x270   : > { %2235 = vst [vmem:[%s4673_s9 + $0x54] sm:$0xf] %v3006_v16  ;;  %1979 = vst [vmem:[%s4685_s12 + $0x50] sm:$0xf] %v2990_v18  ;;  %v1820_v49 = vmul.f32 0.088388346, %v1724_v52  ;;  %v2139_v32 = vadd.f32 %v2123_v58, %v2075_v11  ;;  %v1788_v6 = vmul.f32 %v1768_v29, %v1644_v0  ;;  %v1742_v52 = vmul.f32 %v1630_v37, %v4586_v4 }
 0x271   : > { %v2024_v2 = vpop.permute.xlu0 %2023  ;;  %v1998_v13 = vmul.f32 %v1630_v37, %v4592_v56  ;;  %v2078_v4 = vmul.f32 %v1630_v37, %v4602_v10  ;;  %v1632_v10 = vld [vmem:[%s4117_s2 + $0x78] sm:$0xff] }
 0x272   : > { %v2975_v47 = vpack.c.bf16 %v1820_v49, %v1820_v49  ;;  %v3022_v62 = vpack.c.bf16 %v2139_v32, %v2139_v32  ;;  %v1804_v27 = vadd.f32 %v1788_v6, %v1740_v53  ;;  %v2044_v14 = vmul.f32 %v2024_v2, %v1644_v0  ;;  %v1631_v2 = vld [vmem:[%s4117_s2 + $0x70] sm:$0xff]  ;;  %s2457_s2 = sadd.s32 %s3044_s1, %s2949_s28 }
 0x273   : > { %v2104_v55 = vpop.permute.xlu1 %2103  ;;  %v1663_v56 = vmul.f32 %v1631_v2, %v4606_v50  ;;  %s4833_s8 = sshll.u32 %s2457_s2, 6 }
 0x274   : > { %1900 = vst [vmem:[%s4673_s9 + $0x58] sm:$0xf] %v2975_v47  ;;  %2315 = vst [vmem:[%s4685_s12 + $0x54] sm:$0xf] %v3022_v62  ;;  %v2991_v57 = vpack.c.bf16 %v1804_v27, %v1804_v27  ;;  %v2060_v34 = vadd.f32 %v2044_v14, %v1996_v30  ;;  %v2124_v1 = vmul.f32 %v2104_v55, %v1644_v0  ;;  %v1646_v0 = vld [vmem:[%s4632_s10 + $0x68] sm:$0xff]  ;;  %v1647_v62 = vld [vmem:[%s4632_s10 + $0x70] sm:$0xff]  ;;  %s4842_s16 = scalar_lea.hbm %s5145_s6, %s4833_s8 }
 0x275   : > { %v1690_v15 = vpop.permute.xlu0 %1689 }
 0x276   : > { %1980 = vst [vmem:[%s4685_s12 + $0x58] sm:$0xf] %v2991_v57  ;;  %v2156_v59 = vmul.f32 0.088388346, %v2060_v34  ;;  %v2140_v38 = vadd.f32 %v2124_v1, %v2076_v54  ;;  %v1709_v40 = vmul.f32 %v1690_v15, %v1645_v35  ;;  %v1999_v34 = vmul.f32 %v1631_v2, %v4623_v63 }
 0x277   : > { %v2026_v20 = vpop.permute.xlu1 %2025  ;;  %v1664_v63 = vmul.f32 %v1632_v10, %v4644_v26 }
 0x278   : > { %v3007_v7 = vpack.c.bf16 %v2156_v59, %v2156_v59  ;;  %v3023_v5 = vpack.c.bf16 %v2140_v38, %v2140_v38  ;;  %v1725_v41 = vadd.f32 %v1709_v40, %v1661_v9  ;;  %v2045_v60 = vmul.f32 %v2026_v20, %v1645_v35 }
 0x279   : > { %v1770_v3 = vpop.permute.xlu0 %1769  ;;  %v1743_v20 = vmul.f32 %v1631_v2, %v4627_v28 }
 0x27a   : > { %2236 = vst [vmem:[%s4673_s9 + $0x5c] sm:$0xf] %v3007_v7  ;;  %2316 = vst [vmem:[%s4685_s12 + $0x5c] sm:$0xf] %v3023_v5  ;;  %v1821_v12 = vmul.f32 0.088388346, %v1725_v41  ;;  %v2061_v39 = vadd.f32 %v2045_v60, %v1997_v25  ;;  %v1789_v23 = vmul.f32 %v1770_v3, %v1645_v35 }
 0x27b   : > { %v1692_v22 = vpop.permute.xlu1 %1691  ;;  %v1648_v25 = vld [vmem:[%s4632_s10 + $0x78] sm:$0xff]  ;;  %s3766_s10 = smov [#allocation12]  }
 0x27c   : > { %v2976_v43 = vpack.c.bf16 %v1821_v12, %v1821_v12  ;;  %v2157_v42 = vmul.f32 0.088388346, %v2061_v39  ;;  %v1805_v61 = vadd.f32 %v1789_v23, %v1741_v36  ;;  %v1710_v24 = vmul.f32 %v1692_v22, %v1646_v0  ;;  %s3571_s29 = sshll.u32 %s3766_s10, 4  ;;  %s3572_s29 = int_to_ptr.vmem [resolvable:$false] %s3571_s29 }
 0x27d   : > { %v2106_v44 = vpop.permute.xlu0 %2105  ;;  %v2000_v36 = vmul.f32 %v1632_v10, %v4652_v31  ;;  %v1744_v22 = vmul.f32 %v1632_v10, %v4661_v46  ;;  %s3573_s5 = scalar_lea.vmem %s3572_s29, 4096  ;;  %p3574_p8 = scmp.lt.s32.totalorder %s4844_s3, %s3572_s29 }
 0x27e   : > { %1901 = vst [vmem:[%s4673_s9 + $0x60] sm:$0xf] %v2976_v43  ;;  %v3008_v11 = vpack.c.bf16 %v2157_v42, %v2157_v42  ;;  %v2992_v48 = vpack.c.bf16 %v1805_v61, %v1805_v61  ;;  %v1726_v17 = vadd.f32 %v1710_v24, %v1662_v45  ;;  %v2125_v16 = vmul.f32 %v2106_v44, %v1645_v35  ;;  %p3575_p6 = scmp.lt.s32.totalorder %s3573_s5, %s3567_s26 }
 0x27f   : > { %v1772_v18 = vpop.permute.xlu1 %1771  ;;  %v2079_v24 = vmul.f32 %v1631_v2, %v4668_v51 }
 0x280   : > { %2237 = vst [vmem:[%s4673_s9 + $0x64] sm:$0xf] %v3008_v11  ;;  %1981 = vst [vmem:[%s4685_s12 + $0x60] sm:$0xf] %v2992_v48  ;;  %v1822_v21 = vmul.f32 0.088388346, %v1726_v17  ;;  %v2141_v58 = vadd.f32 %v2125_v16, %v2077_v33  ;;  %v1790_v29 = vmul.f32 %v1772_v18, %v1646_v0  ;;  %v2080_v48 = vmul.f32 %v1632_v10, %v4678_v8  ;;  %p3576_p7 = por %p3575_p6, %p3574_p8 }
 0x281   : > { %v2028_v53 = vpop.permute.xlu0 %2027 }
 0x282   : > { %v2977_v49 = vpack.c.bf16 %v1822_v21, %v1822_v21  ;;  %v3024_v32 = vpack.c.bf16 %v2141_v58, %v2141_v58  ;;  %v1806_v6 = vadd.f32 %v1790_v29, %v1742_v52  ;;  %v2046_v30 = vmul.f32 %v2028_v53, %v1646_v0  ;;  %p3577_p3 = pnand %p3576_p7, %p3570_p4 }
 0x283   : > { %v2108_v47 = vpop.permute.xlu1 %2107 }
 0x284   : > { %1902 = vst [vmem:[%s4673_s9 + $0x68] sm:$0xf] %v2977_v49  ;;  %2317 = vst [vmem:[%s4685_s12 + $0x64] sm:$0xf] %v3024_v32  ;;  %v2993_v27 = vpack.c.bf16 %v1806_v6, %v1806_v6  ;;  %v2062_v14 = vadd.f32 %v2046_v30, %v1998_v13  ;;  %v2126_v19 = vmul.f32 %v2108_v47, %v1646_v0 }
 0x285   : > { %v1694_v55 = vpop.permute.xlu0 %1693 }
 0x286   : > { %1982 = vst [vmem:[%s4685_s12 + $0x68] sm:$0xf] %v2993_v27  ;;  %v2158_v35 = vmul.f32 0.088388346, %v2062_v14  ;;  %v2142_v54 = vadd.f32 %v2126_v19, %v2078_v4  ;;  %v1711_v57 = vmul.f32 %v1694_v55, %v1647_v62 }
 0x287   : > { %v2030_v1 = vpop.permute.xlu1 %2029 }
 0x288   : > { %v3009_v15 = vpack.c.bf16 %v2158_v35, %v2158_v35  ;;  %v3025_v9 = vpack.c.bf16 %v2142_v54, %v2142_v54  ;;  %v1727_v59 = vadd.f32 %v1711_v57, %v1663_v56  ;;  %v2047_v38 = vmul.f32 %v2030_v1, %v1647_v62 }
 0x289   : > { %v1774_v40 = vpop.permute.xlu0 %1773 }
 0x28a   : > { %2238 = vst [vmem:[%s4673_s9 + $0x6c] sm:$0xf] %v3009_v15  ;;  %2318 = vst [vmem:[%s4685_s12 + $0x6c] sm:$0xf] %v3025_v9  ;;  %v1823_v50 = vmul.f32 0.088388346, %v1727_v59  ;;  %v2063_v37 = vadd.f32 %v2047_v38, %v1999_v34  ;;  %v1791_v7 = vmul.f32 %v1774_v40, %v1647_v62 }
 0x28b   : > { %v1696_v5 = vpop.permute.xlu1 %1695 }
 0x28c   : > { %v2978_v41 = vpack.c.bf16 %v1823_v50, %v1823_v50  ;;  %v2159_v60 = vmul.f32 0.088388346, %v2063_v37  ;;  %v1807_v3 = vadd.f32 %v1791_v7, %v1743_v20  ;;  %v1712_v0 = vmul.f32 %v1696_v5, %v1648_v25 }
 0x28d   : > { %v2032_v28 = vpop.permute.xlu0 %2031 }
 0x28e   : > { %1903 = vst [vmem:[%s4673_s9 + $0x70] sm:$0xf] %v2978_v41  ;;  %v3010_v12 = vpack.c.bf16 %v2159_v60, %v2159_v60  ;;  %v2994_v39 = vpack.c.bf16 %v1807_v3, %v1807_v3  ;;  %v1728_v23 = vadd.f32 %v1712_v0, %v1664_v63  ;;  %v2048_v45 = vmul.f32 %v2032_v28, %v1648_v25 }
 0x28f   : > { %v1776_v26 = vpop.permute.xlu1 %1775 }
 0x290   : > { %2239 = vst [vmem:[%s4673_s9 + $0x74] sm:$0xf] %v3010_v12  ;;  %1983 = vst [vmem:[%s4685_s12 + $0x70] sm:$0xf] %v2994_v39  ;;  %v1824_v43 = vmul.f32 0.088388346, %v1728_v23  ;;  %v2064_v42 = vadd.f32 %v2048_v45, %v2000_v36  ;;  %v1792_v61 = vmul.f32 %v1776_v26, %v1648_v25 }
 0x291   : > { %v2110_v31 = vpop.permute.xlu0 %2109 }
 0x292   : > { %v2979_v33 = vpack.c.bf16 %v1824_v43, %v1824_v43  ;;  %v2160_v44 = vmul.f32 0.088388346, %v2064_v42  ;;  %v1808_v11 = vadd.f32 %v1792_v61, %v1744_v22  ;;  %v2127_v46 = vmul.f32 %v2110_v31, %v1647_v62 }
 0x293   : > { %v2112_v17 = vpop.permute.xlu1 %2111 }
 0x294   : > { %1904 = vst [vmem:[%s4673_s9 + $0x78] sm:$0xf] %v2979_v33  ;;  %v3011_v51 = vpack.c.bf16 %v2160_v44, %v2160_v44  ;;  %v2995_v16 = vpack.c.bf16 %v1808_v11, %v1808_v11  ;;  %v2143_v18 = vadd.f32 %v2127_v46, %v2079_v24  ;;  %v2128_v52 = vmul.f32 %v2112_v17, %v1648_v25 }
 0x296   : > { %2240 = vst [vmem:[%s4673_s9 + $0x7c] sm:$0xf] %v3011_v51  ;;  %1984 = vst [vmem:[%s4685_s12 + $0x78] sm:$0xf] %v2995_v16  ;;  %v3026_v8 = vpack.c.bf16 %v2143_v18, %v2143_v18  ;;  %v2144_v21 = vadd.f32 %v2128_v52, %v2080_v48 }
 0x297   : > { %3580 = shalt.err (!%p3577_p3)
}
 0x298   : > { %s3581_s0 = scalar_lea.hbm %s4842_s16, 2048  ;;  %s3585_s28 = scalar_lea.hbm %s5145_s6, 8192 }
 0x299   : > { %p3582_p11 = scmp.ne.s32.totalorder %s4842_s16, %s3581_s0  ;;  %p3586_p10 = scmp.lt.s32.totalorder %s4842_s16, %s5145_s6 }
 0x29a   : > { %p3587_p5 = scmp.lt.s32.totalorder %s3585_s28, %s3581_s0 }
 0x29b   : > { %p3583_p2 = pnand %p3582_p11, %p5146_p0 }
 0x29c   : > { %p3588_p13 = por %p3587_p5, %p3586_p10 }
 0x29d   : > { %p3584_p9 = pneg %p3583_p2 }
 0x29f   : > { %p3589_p12 = pnand %p3588_p13, %p3584_p9 }
 0x2a1   : > { %3592 = shalt.err (!%p3589_p12)
}
 0x2a2   : > { %s3767_s13 = smov 128   ;;  %s3768_s26 = smov 8   ;;  %2319 = vst [vmem:[%s4685_s12 + $0x74] sm:$0xf] %v3026_v8  ;;  %v3027_v58 = vpack.c.bf16 %v2144_v21, %v2144_v21 }
 0x2a3   : > { %3097 = dma.vmem_to_hbm [thread:$0]  (%p5146_p0), %s4844_s3, 2048, %s4842_s16, %s4852_s22, %s3767_s13, %s3767_s13, %s3768_s26  }
 0x2a4   : > { %s5147_s5 = sld [smem:[#allocation65_spill]]  ;;  %2320 = vst [vmem:[%s4685_s12 + $0x7c] sm:$0xf] %v3027_v58  ;;  %s4902_s3 = scalar_lea.sflag [#allocation14], %s471_s24 }
 0x2a5   : > { %s5148_s28 = sld [smem:[#allocation66_spill]]  ;;  %s3593_s16 = scalar_lea.vmem %s4887_s15, 2048 }
 0x2a6   : > { %p3594_p1 = scmp.ne.s32.totalorder %s4887_s15, %s3593_s16  ;;  %s3769_s22 = smov [#allocation13]  }
 0x2a7   : > { %s3597_s4 = sshll.u32 %s3769_s22, 4  ;;  %s3598_s4 = int_to_ptr.vmem [resolvable:$false] %s3597_s4 }
 0x2a8   : > { %p3595_p4 = pnand %p3594_p1, %p5146_p0  ;;  %s3599_s10 = scalar_lea.vmem %s3598_s4, 4096 }
 0x2a9   : > { %p3600_p6 = scmp.lt.s32.totalorder %s4887_s15, %s3598_s4  ;;  %p3601_p7 = scmp.lt.s32.totalorder %s3599_s10, %s3593_s16 }
 0x2aa   : > { %s4883_s0 = scalar_lea.hbm %s5147_s5, %s4833_s8  ;;  %p3596_p8 = pneg %p3595_p4 }
 0x2ab   : > { %s4893_s2 = scalar_lea.hbm %s5148_s28, %s4833_s8  ;;  %p3602_p3 = por %p3601_p7, %p3600_p6 }
 0x2ad   : > { %p3603_p11 = pnand %p3602_p3, %p3596_p8 }
 0x2af   : > { %3606 = shalt.err (!%p3603_p11)
}
 0x2b0   : > { %s3607_s23 = scalar_lea.hbm %s4883_s0, 2048  ;;  %s3611_s12 = scalar_lea.hbm %s5147_s5, 8192 }
 0x2b1   : > { %p3608_p2 = scmp.ne.s32.totalorder %s4883_s0, %s3607_s23  ;;  %p3612_p5 = scmp.lt.s32.totalorder %s4883_s0, %s5147_s5 }
 0x2b2   : > { %p3613_p13 = scmp.lt.s32.totalorder %s3611_s12, %s3607_s23 }
 0x2b3   : > { %p3609_p9 = pnand %p3608_p2, %p5146_p0 }
 0x2b4   : > { %p3614_p12 = por %p3613_p13, %p3612_p5 }
 0x2b5   : > { %p3610_p10 = pneg %p3609_p9 }
 0x2b7   : > { %p3615_p1 = pnand %p3614_p12, %p3610_p10 }
 0x2b9   : > { %3618 = shalt.err (!%p3615_p1)
}
 0x2ba   : > { %3098 = dma.vmem_to_hbm [thread:$0]  (%p5146_p0), %s4887_s15, 2048, %s4883_s0, %s4902_s3, %s3767_s13, %s3767_s13, %s3768_s26  }
 0x2bb   : > { %s3619_s9 = scalar_lea.vmem %s4897_s14, 2048  ;;  %s3770_s1 = smov [#allocation15]  }
 0x2bc   : > { %p3620_p4 = scmp.ne.s32.totalorder %s4897_s14, %s3619_s9  ;;  %s3623_s16 = sshll.u32 %s3770_s1, 4  ;;  %s3624_s16 = int_to_ptr.vmem [resolvable:$false] %s3623_s16 }
 0x2bd   : > { %s3625_s22 = scalar_lea.vmem %s3624_s16, 4096  ;;  %p3626_p7 = scmp.lt.s32.totalorder %s4897_s14, %s3624_s16 }
 0x2be   : > { %p3621_p8 = pnand %p3620_p4, %p5146_p0  ;;  %p3627_p3 = scmp.lt.s32.totalorder %s3625_s22, %s3619_s9 }
 0x2c0   : > { %p3622_p6 = pneg %p3621_p8  ;;  %p3628_p11 = por %p3627_p3, %p3626_p7 }
 0x2c2   : > { %p3629_p2 = pnand %p3628_p11, %p3622_p6 }
 0x2c4   : > { %3632 = shalt.err (!%p3629_p2)
}
 0x2c5   : > { %s3633_s4 = scalar_lea.hbm %s4893_s2, 2048  ;;  %s3637_s10 = scalar_lea.hbm %s5148_s28, 8192 }
 0x2c6   : > { %p3634_p9 = scmp.ne.s32.totalorder %s4893_s2, %s3633_s4  ;;  %p3638_p13 = scmp.lt.s32.totalorder %s4893_s2, %s5148_s28 }
 0x2c7   : > { %p3639_p12 = scmp.lt.s32.totalorder %s3637_s10, %s3633_s4 }
 0x2c8   : > { %p3635_p10 = pnand %p3634_p9, %p5146_p0 }
 0x2c9   : > { %p3640_p1 = por %p3639_p12, %p3638_p13 }
 0x2ca   : > { %p3636_p5 = pneg %p3635_p10 }
 0x2cc   : > { %p3641_p4 = pnand %p3640_p1, %p3636_p5 }
 0x2ce   : > { %3644 = shalt.err (!%p3641_p4)
}
 0x2cf   : > { %3099 = dma.vmem_to_hbm [thread:$0]  (%p5146_p0), %s4897_s14, 2048, %s4893_s2, %s4902_s3, %s3767_s13, %s3767_s13, %s3768_s26  }
 0x2d0 PF: > { %p3140_p8 = scmp.ge.s32.totalorder %s3755_s27, 2  ;;  %s2513_s7 = sand.u32 1, %s3727_s20  }
 0x2d1   : > { %p5149_p6 = scmp.ne.s32.totalorder %s5069_s30, 0  ;;  %s2514_s12 = scalar_lea.sflag [#allocation4], %s2513_s7 }
 0x2d3   : > { %p3124_p7 = pnand %p3140_p8, %p5149_p6 }
 0x2d5   : > { %p3125_p3 = pneg %p3124_p7 }
 0x2d7   : > { %3706 = dma.done.wait (%p3125_p3), %s2514_s12, 2048  }
 0x2d8   : > { %3708 = vsyncadd (%p3125_p3), %s2514_s12, 4294965248  ;;  %s5150_s17 = sadd.s32 4294967294, %s3755_s27  }
 0x2d9   : > { %s2522_s8 = sand.u32 1, %s5150_s17  }
 0x2da   : > { %s2523_s29 = scalar_lea.sflag [#allocation14], %s2522_s8 }
 0x2db   : > { %3710 = dma.done.wait (%p3125_p3), %s2523_s29, 4096  }
 0x2dc   : > { %3712 = vsyncadd (%p3125_p3), %s2523_s29, 4294963200  ;;  %s33_s27 = sadd.s32 1, %s3755_s27   ;;  %s5151_s14 = sld [smem:[#allocation22_spill]] }
 0x2dd   : > { %p30_p0 = scmp.ge.s32.totalorder %s33_s27, 6   ;;  %s5152_s22 = sld [smem:[#allocation28_spill]] }
 0x2de   : > { %s5153_s24 = sld [smem:[#allocation25_spill]]  ;;  %s5156_s17 = smov %s3719_s18 }
 0x2df   : > { %s5154_s30 = sld [smem:[#allocation26_spill]]  ;;  %s5157_s18 = smov %s3723_s19 }
 0x2e0   : > { %s5155_s26 = sld [smem:[#allocation27_spill]]  ;;  %s5158_s19 = smov %s3999_s11 }
 0x2e1   : > { %s5159_s20 = smov %s3731_s21  ;;  %s5161_s23 = smov %s3747_s25 }
 0x2e2   : > { %s5160_s21 = smov %s5151_s14  ;;  %32 = sbr.rel (!%p30_p0) target bundleno = 26 (0x1a), region = 167 }
 0x2e5   : > { %s5162_s25 = smov %s5154_s30 }
 0x2e7   :  { %2537 = vsyncpa [#allocation3], 1 }
 0x2e8   :  { %2539 = vsyncpa [#allocation3 + $0x1], 1 }
 0x2e9   :  { %2540 = vsyncpa [#allocation6], 1 }
 0x2ea   :  { %2541 = vsyncpa [#allocation9], 1 }
 0x2eb   :  { %2542 = vsyncpa [#allocation4], 1 }
 0x2ec   :  { %2544 = vsyncpa [#allocation4 + $0x1], 1 }
 0x2ed   :  { %2545 = vsyncpa [#allocation14], 1 }
 0x2ee   :  { %2547 = vsyncpa [#allocation14 + $0x1], 1 }

</bundles_post_ra>
